<compile_context>
chip_gen: v6e
topology: v6e:2x2x1
jax: 0.10.0
libtpu: 0.0.40
codegen_flags: <defaults>
</compile_context>

<pallas_src>
import jax
import jax.numpy as jnp
import numpy as np
from jax.experimental import pallas as pl
from jax.experimental.pallas import tpu as pltpu

# ---- small, module-consistent shapes ----
B, L, D = 2, 16, 32          # batch, seq_len, d_model
H, E = 4, 8                  # n_heads, head_dim (D = H * E)
D_FF = 4 * D                 # d_ff = 4 * d_model (Autoformer default)
MA_K = 5                     # moving_avg kernel size (odd)
ATTN_SCALE = 1.0 / float(np.sqrt(E))
ATTN_DTYPE = jnp.bfloat16    # per perf review; use jnp.float32 for exact-f32 attn
assert D == H * E and MA_K % 2 == 1


def _build_ma_matrix():
    """(L, L) matrix implementing replicate-padded AvgPool1d(MA_K, stride=1)."""
    pad = (MA_K - 1) // 2
    m = np.zeros((L, L), np.float32)
    for i in range(L):
        for j in range(i - pad, i + pad + 1):
            m[i, min(max(j, 0), L - 1)] += 1.0 / MA_K
    return m


def _build_ma_block_diag():
    """Block-diagonal (B*L, B*L) moving-average matrix for batch-folded rows."""
    m = _build_ma_matrix()
    bd = np.zeros((B * L, B * L), np.float32)
    for b in range(B):
        bd[b * L:(b + 1) * L, b * L:(b + 1) * L] = m
    return bd


def encoder_layer_kernel(x_ref, ma_ref, wqkvo_ref, w1_ref, w2_ref,
                         out_ref, attn_ref):
    bf = jnp.bfloat16
    f32 = jnp.float32

    x = x_ref[...]                        # (B*L, D) f32, batch-folded rows
    xb = x.astype(bf)

    # ---- fused Q/K/V projection --------------------------------------------
    # wqkvo = [Wq | Wk | Wv | Wo] is one aligned (D, 4*D) = (32, 128) bf16 tile.
    # One MXU launch produces all three projections; the last D output columns
    # (x @ Wo) are a discarded by-product of keeping the RHS a full 128-lane tile.
    wqkvo = wqkvo_ref[...]                                    # (D, 4D) bf16
    qkv = jnp.dot(xb, wqkvo, preferred_element_type=f32).astype(bf)   # (B*L, 4D) bf16
    wo = wqkvo[:, 3 * D:]                                     # (D, D) bf16

    # ---- attention core: static loop over the (tiny) batch, heads batched ----
    ctx_rows = []
    for b in range(B):                    # B == 2, fully unrolled (no grid step)
        qkv_b = qkv[b * L:(b + 1) * L]                        # (L, 3D) bf16
        # bf16 cast already done above -> relayouts below move half the bytes.
        q3 = jnp.transpose(qkv_b[:, 0 * D:1 * D].reshape(L, H, E), (1, 0, 2))
        k3 = jnp.transpose(qkv_b[:, 1 * D:2 * D].reshape(L, H, E), (1, 0, 2))
        v3 = jnp.transpose(qkv_b[:, 2 * D:3 * D].reshape(L, H, E), (1, 0, 2))

        s = jnp.einsum('hle,hme->hlm', q3, k3,
                       preferred_element_type=f32) * ATTN_SCALE       # (H, L, L)
        s = s - jnp.max(s, axis=-1, keepdims=True)
        p = jnp.exp(s)
        p = p * pl.reciprocal(jnp.sum(p, axis=-1, keepdims=True), approx=True)

        # Natural-layout store (no in-kernel lane repack), downcast to bf16.
        attn_ref[b] = p.astype(attn_ref.dtype)

        ctx = jnp.einsum('hlm,hme->hle', p.astype(bf), v3,
                         preferred_element_type=f32)                  # (H, L, E)
        ctx_rows.append(jnp.transpose(ctx, (1, 0, 2)).reshape(L, D))  # (L, D)

    ctx_all = jnp.concatenate(ctx_rows, axis=0)               # (B*L, D) f32
    new_x = jnp.dot(ctx_all.astype(bf), wo, preferred_element_type=f32)

    # ---- residual + series decomposition 1 (dropout == identity) ------------
    x1 = x + new_x
    ma = ma_ref[...]                                          # (B*L, B*L) bf16 block-diag
    res1 = x1 - jnp.dot(ma, x1.astype(bf), preferred_element_type=f32)

    # ---- FFN: Conv1d(k=1) -> ReLU -> Conv1d(k=1) == two matmuls over D ------
    y = jnp.maximum(jnp.dot(res1.astype(bf), w1_ref[...],
                            preferred_element_type=f32), 0.0)         # (B*L, D_FF)
    y = jnp.dot(y.astype(bf), w2_ref[...], preferred_element_type=f32)

    # ---- residual + series decomposition 2 ----------------------------------
    s2 = res1 + y
    out_ref[...] = s2 - jnp.dot(ma, s2.astype(bf), preferred_element_type=f32)


def pack_params(wq, wk, wv, wo, w1, w2):
    """One-time packing/cast of parameters (persist these, don't redo per call)."""
    bf = jnp.bfloat16
    wqkvo = jnp.concatenate([wq, wk, wv, wo], axis=1).astype(bf)   # (D, 4D) bf16
    ma_bd = jnp.asarray(_build_ma_block_diag()).astype(bf)         # (B*L, B*L) bf16
    return wqkvo, ma_bd, w1.astype(bf), w2.astype(bf)


def encoder_layer(x, wqkvo, ma_bd, w1, w2):
    # Wrapper-side batch fold / un-fold is layout plumbing only.
    x2d = x.reshape(B * L, D)
    vmem = pl.BlockSpec(memory_space=pltpu.MemorySpace.VMEM)   # whole array in VMEM
    out2d, attn = pl.pallas_call(
        encoder_layer_kernel,
        out_shape=(jax.ShapeDtypeStruct((B * L, D), jnp.float32),
                   jax.ShapeDtypeStruct((B, H, L, L), ATTN_DTYPE)),
        in_specs=[vmem] * 5,
        out_specs=(vmem, vmem),
        # No grid: single launch; batch is folded so the single-TC chips
        # (v5e/v6e) pay zero grid-step overhead and weights are DMA'd once.
    )(x2d, ma_bd, wqkvo, w1, w2)
    return out2d.reshape(B, L, D), attn


# ---- pure-JAX reference (mirrors the kernel's bf16-operand / f32-acc math) ----
def reference(x, wq, wk, wv, wo, w1, w2):
    bf = jnp.bfloat16
    f32 = jnp.float32
    ma = jnp.asarray(_build_ma_matrix()).astype(bf)

    def mavg(z):  # (B, L, D) -> (B, L, D), bf16 operands, f32 accumulation
        return jnp.einsum('lm,bmd->bld', ma, z.astype(bf), preferred_element_type=f32)

    xb = x.astype(bf)
    q = jnp.einsum('bld,de->ble', xb, wq.astype(bf), preferred_element_type=f32).astype(bf)
    k = jnp.einsum('bld,de->ble', xb, wk.astype(bf), preferred_element_type=f32).astype(bf)
    v = jnp.einsum('bld,de->ble', xb, wv.astype(bf), preferred_element_type=f32).astype(bf)
    q = q.reshape(B, L, H, E); k = k.reshape(B, L, H, E); v = v.reshape(B, L, H, E)

    s = jnp.einsum('blhe,bmhe->bhlm', q, k, preferred_element_type=f32) * ATTN_SCALE
    p = jax.nn.softmax(s, axis=-1)
    ctx = jnp.einsum('bhlm,bmhe->blhe', p.astype(bf), v,
                     preferred_element_type=f32).reshape(B, L, D)
    new_x = jnp.einsum('bld,de->ble', ctx.astype(bf), wo.astype(bf),
                       preferred_element_type=f32)
    x1 = x + new_x
    res1 = x1 - mavg(x1)
    y = jnp.maximum(jnp.einsum('bld,df->blf', res1.astype(bf), w1.astype(bf),
                               preferred_element_type=f32), 0.0)
    y = jnp.einsum('blf,fd->bld', y.astype(bf), w2.astype(bf),
                   preferred_element_type=f32)
    s2 = res1 + y
    return s2 - mavg(s2), p


if __name__ == "__main__":
    key = jax.random.PRNGKey(0)
    ks = jax.random.split(key, 7)
    # Deterministic synthetic parameters. (PyTorch stores Linear/Conv1d weights
    # as (out, in); we keep the already-transposed (in, out) matmul operands.)
    wq = 0.1 * jax.random.normal(ks[0], (D, D), jnp.float32)
    wk = 0.1 * jax.random.normal(ks[1], (D, D), jnp.float32)
    wv = 0.1 * jax.random.normal(ks[2], (D, D), jnp.float32)
    wo = 0.1 * jax.random.normal(ks[3], (D, D), jnp.float32)
    w1 = 0.1 * jax.random.normal(ks[4], (D, D_FF), jnp.float32)   # conv1 (k=1)
    w2 = 0.1 * jax.random.normal(ks[5], (D_FF, D), jnp.float32)   # conv2 (k=1)
    x = jax.random.normal(ks[6], (B, L, D), jnp.float32)

    params = pack_params(wq, wk, wv, wo, w1, w2)   # one-time bf16 weight packing
    out, attn = encoder_layer(x, *params)
    jax.block_until_ready((out, attn))

    ref_out, ref_attn = reference(x, wq, wk, wv, wo, w1, w2)
    np.testing.assert_allclose(np.asarray(out), np.asarray(ref_out),
                               rtol=5e-3, atol=5e-3)
    np.testing.assert_allclose(np.asarray(attn.astype(jnp.float32)),
                               np.asarray(ref_attn), rtol=1e-2, atol=1e-2)
    print("KERNEL_OK")
</pallas_src>

<mosaic_0001>
module attributes {stable_mosaic.version = 11 : i64} {
  func.func @encoder_layer_kernel(%arg0: memref<32x32xf32, #tpu.memory_space<vmem>>, %arg1: memref<32x32xbf16, #tpu.memory_space<vmem>>, %arg2: memref<32x128xbf16, #tpu.memory_space<vmem>>, %arg3: memref<32x128xbf16, #tpu.memory_space<vmem>>, %arg4: memref<128x32xbf16, #tpu.memory_space<vmem>>, %arg5: memref<32x32xf32, #tpu.memory_space<vmem>>, %arg6: memref<2x4x16x16xbf16, #tpu.memory_space<vmem>>) attributes {dimension_semantics = [], scalar_prefetch = 0 : i64, scratch_operands = 0 : i64, tpu.core_type = #tpu.core_type<tc>} {
    %c0 = arith.constant 0 : index
    %c0_0 = arith.constant 0 : index
    %0 = vector.load %arg0[%c0, %c0_0] : memref<32x32xf32, #tpu.memory_space<vmem>>, vector<32x32xf32>
    %1 = arith.truncf %0 : vector<32x32xf32> to vector<32x32xbf16>
    %c0_1 = arith.constant 0 : index
    %c0_2 = arith.constant 0 : index
    %2 = vector.load %arg2[%c0_1, %c0_2] : memref<32x128xbf16, #tpu.memory_space<vmem>>, vector<32x128xbf16>
    %cst = arith.constant dense<0.000000e+00> : vector<32x128xf32>
    %3 = tpu.matmul %1, %2, %cst {dimension_numbers = #tpu.dot_dimension_numbers<[1], [0], [0], [1], [0, 0, 1, 1], [], []>} : vector<32x32xbf16>, vector<32x128xbf16>, vector<32x128xf32> -> vector<32x128xf32>
    %4 = arith.truncf %3 : vector<32x128xf32> to vector<32x128xbf16>
    %5 = vector.extract_strided_slice %2 {offsets = [0, 96], sizes = [32, 32], strides = [1, 1]} : vector<32x128xbf16> to vector<32x32xbf16>
    %6 = vector.extract_strided_slice %4 {offsets = [0, 0], sizes = [16, 128], strides = [1, 1]} : vector<32x128xbf16> to vector<16x128xbf16>
    %7 = vector.extract_strided_slice %6 {offsets = [0, 0], sizes = [16, 32], strides = [1, 1]} : vector<16x128xbf16> to vector<16x32xbf16>
    %8 = vector.shape_cast %7 : vector<16x32xbf16> to vector<16x4x8xbf16>
    %9 = tpu.transpose %8, [1, 0, 2] : vector<16x4x8xbf16> -> vector<4x16x8xbf16>
    %10 = vector.extract_strided_slice %6 {offsets = [0, 32], sizes = [16, 32], strides = [1, 1]} : vector<16x128xbf16> to vector<16x32xbf16>
    %11 = vector.shape_cast %10 : vector<16x32xbf16> to vector<16x4x8xbf16>
    %12 = tpu.transpose %11, [1, 0, 2] : vector<16x4x8xbf16> -> vector<4x16x8xbf16>
    %13 = vector.extract_strided_slice %6 {offsets = [0, 64], sizes = [16, 32], strides = [1, 1]} : vector<16x128xbf16> to vector<16x32xbf16>
    %14 = vector.shape_cast %13 : vector<16x32xbf16> to vector<16x4x8xbf16>
    %15 = tpu.transpose %14, [1, 0, 2] : vector<16x4x8xbf16> -> vector<4x16x8xbf16>
    "tpu.trace_start"() <{level = 10 : i32, message = "hle,hme->hlm"}> : () -> ()
    %cst_3 = arith.constant dense<0.000000e+00> : vector<4x16x16xf32>
    %16 = tpu.matmul %9, %12, %cst_3 {dimension_numbers = #tpu.dot_dimension_numbers<[2], [2], [1], [1], [0, 0, 0, 1, 1, 1], [0], [0]>} : vector<4x16x8xbf16>, vector<4x16x8xbf16>, vector<4x16x16xf32> -> vector<4x16x16xf32>
    "tpu.trace_stop"() : () -> ()
    %cst_4 = arith.constant 0.353553385 : f32
    %17 = vector.broadcast %cst_4 : f32 to vector<4x16x16xf32>
    %18 = arith.mulf %16, %17 : vector<4x16x16xf32>
    %cst_5 = arith.constant dense<0xFF800000> : vector<4x16xf32>
    %19 = vector.multi_reduction <maximumf>, %18, %cst_5 [2] : vector<4x16x16xf32> to vector<4x16xf32>
    %20 = vector.shape_cast %19 : vector<4x16xf32> to vector<4x16x1xf32>
    %21 = vector.broadcast %20 : vector<4x16x1xf32> to vector<4x16x16xf32>
    %22 = arith.subf %18, %21 : vector<4x16x16xf32>
    %23 = math.exp %22 : vector<4x16x16xf32>
    %cst_6 = arith.constant dense<0.000000e+00> : vector<4x16xf32>
    %24 = vector.multi_reduction <add>, %23, %cst_6 [2] : vector<4x16x16xf32> to vector<4x16xf32>
    %25 = vector.shape_cast %24 : vector<4x16xf32> to vector<4x16x1xf32>
    %26 = tpu.reciprocal %25 {approx = true} : vector<4x16x1xf32> -> vector<4x16x1xf32>
    %27 = vector.broadcast %26 : vector<4x16x1xf32> to vector<4x16x16xf32>
    %28 = arith.mulf %23, %27 : vector<4x16x16xf32>
    %29 = arith.truncf %28 : vector<4x16x16xf32> to vector<4x16x16xbf16>
    %c0_7 = arith.constant 0 : index
    %c0_8 = arith.constant 0 : index
    %c0_9 = arith.constant 0 : index
    %c0_10 = arith.constant 0 : index
    %30 = vector.load %arg6[%c0_7, %c0_8, %c0_9, %c0_10] : memref<2x4x16x16xbf16, #tpu.memory_space<vmem>>, vector<1x4x16x16xbf16>
    %31 = vector.shape_cast %30 : vector<1x4x16x16xbf16> to vector<4x16x16xbf16>
    %32 = vector.shape_cast %29 : vector<4x16x16xbf16> to vector<1x4x16x16xbf16>
    tpu.vector_store %arg6[%c0_7, %c0_8, %c0_9, %c0_10], %32 {strides = array<i32>} : memref<2x4x16x16xbf16, #tpu.memory_space<vmem>>, vector<1x4x16x16xbf16>,
    %33 = arith.truncf %28 : vector<4x16x16xf32> to vector<4x16x16xbf16>
    "tpu.trace_start"() <{level = 10 : i32, message = "hlm,hme->hle"}> : () -> ()
    %cst_11 = arith.constant dense<0.000000e+00> : vector<4x16x8xf32>
    %34 = tpu.matmul %33, %15, %cst_11 {dimension_numbers = #tpu.dot_dimension_numbers<[2], [1], [1], [2], [0, 0, 0, 1, 1, 2], [0], [0]>} : vector<4x16x16xbf16>, vector<4x16x8xbf16>, vector<4x16x8xf32> -> vector<4x16x8xf32>
    "tpu.trace_stop"() : () -> ()
    %35 = tpu.transpose %34, [1, 0, 2] : vector<4x16x8xf32> -> vector<16x4x8xf32>
    %36 = vector.shape_cast %35 : vector<16x4x8xf32> to vector<16x32xf32>
    %37 = vector.extract_strided_slice %4 {offsets = [16, 0], sizes = [16, 128], strides = [1, 1]} : vector<32x128xbf16> to vector<16x128xbf16>
    %38 = vector.extract_strided_slice %37 {offsets = [0, 0], sizes = [16, 32], strides = [1, 1]} : vector<16x128xbf16> to vector<16x32xbf16>
    %39 = vector.shape_cast %38 : vector<16x32xbf16> to vector<16x4x8xbf16>
    %40 = tpu.transpose %39, [1, 0, 2] : vector<16x4x8xbf16> -> vector<4x16x8xbf16>
    %41 = vector.extract_strided_slice %37 {offsets = [0, 32], sizes = [16, 32], strides = [1, 1]} : vector<16x128xbf16> to vector<16x32xbf16>
    %42 = vector.shape_cast %41 : vector<16x32xbf16> to vector<16x4x8xbf16>
    %43 = tpu.transpose %42, [1, 0, 2] : vector<16x4x8xbf16> -> vector<4x16x8xbf16>
    %44 = vector.extract_strided_slice %37 {offsets = [0, 64], sizes = [16, 32], strides = [1, 1]} : vector<16x128xbf16> to vector<16x32xbf16>
    %45 = vector.shape_cast %44 : vector<16x32xbf16> to vector<16x4x8xbf16>
    %46 = tpu.transpose %45, [1, 0, 2] : vector<16x4x8xbf16> -> vector<4x16x8xbf16>
    "tpu.trace_start"() <{level = 10 : i32, message = "hle,hme->hlm"}> : () -> ()
    %cst_12 = arith.constant dense<0.000000e+00> : vector<4x16x16xf32>
    %47 = tpu.matmul %40, %43, %cst_12 {dimension_numbers = #tpu.dot_dimension_numbers<[2], [2], [1], [1], [0, 0, 0, 1, 1, 1], [0], [0]>} : vector<4x16x8xbf16>, vector<4x16x8xbf16>, vector<4x16x16xf32> -> vector<4x16x16xf32>
    "tpu.trace_stop"() : () -> ()
    %cst_13 = arith.constant 0.353553385 : f32
    %48 = vector.broadcast %cst_13 : f32 to vector<4x16x16xf32>
    %49 = arith.mulf %47, %48 : vector<4x16x16xf32>
    %cst_14 = arith.constant dense<0xFF800000> : vector<4x16xf32>
    %50 = vector.multi_reduction <maximumf>, %49, %cst_14 [2] : vector<4x16x16xf32> to vector<4x16xf32>
    %51 = vector.shape_cast %50 : vector<4x16xf32> to vector<4x16x1xf32>
    %52 = vector.broadcast %51 : vector<4x16x1xf32> to vector<4x16x16xf32>
    %53 = arith.subf %49, %52 : vector<4x16x16xf32>
    %54 = math.exp %53 : vector<4x16x16xf32>
    %cst_15 = arith.constant dense<0.000000e+00> : vector<4x16xf32>
    %55 = vector.multi_reduction <add>, %54, %cst_15 [2] : vector<4x16x16xf32> to vector<4x16xf32>
    %56 = vector.shape_cast %55 : vector<4x16xf32> to vector<4x16x1xf32>
    %57 = tpu.reciprocal %56 {approx = true} : vector<4x16x1xf32> -> vector<4x16x1xf32>
    %58 = vector.broadcast %57 : vector<4x16x1xf32> to vector<4x16x16xf32>
    %59 = arith.mulf %54, %58 : vector<4x16x16xf32>
    %60 = arith.truncf %59 : vector<4x16x16xf32> to vector<4x16x16xbf16>
    %c1 = arith.constant 1 : index
    %c0_16 = arith.constant 0 : index
    %c0_17 = arith.constant 0 : index
    %c0_18 = arith.constant 0 : index
    %61 = vector.load %arg6[%c1, %c0_16, %c0_17, %c0_18] : memref<2x4x16x16xbf16, #tpu.memory_space<vmem>>, vector<1x4x16x16xbf16>
    %62 = vector.shape_cast %61 : vector<1x4x16x16xbf16> to vector<4x16x16xbf16>
    %63 = vector.shape_cast %60 : vector<4x16x16xbf16> to vector<1x4x16x16xbf16>
    tpu.vector_store %arg6[%c1, %c0_16, %c0_17, %c0_18], %63 {strides = array<i32>} : memref<2x4x16x16xbf16, #tpu.memory_space<vmem>>, vector<1x4x16x16xbf16>,
    %64 = arith.truncf %59 : vector<4x16x16xf32> to vector<4x16x16xbf16>
    "tpu.trace_start"() <{level = 10 : i32, message = "hlm,hme->hle"}> : () -> ()
    %cst_19 = arith.constant dense<0.000000e+00> : vector<4x16x8xf32>
    %65 = tpu.matmul %64, %46, %cst_19 {dimension_numbers = #tpu.dot_dimension_numbers<[2], [1], [1], [2], [0, 0, 0, 1, 1, 2], [0], [0]>} : vector<4x16x16xbf16>, vector<4x16x8xbf16>, vector<4x16x8xf32> -> vector<4x16x8xf32>
    "tpu.trace_stop"() : () -> ()
    %66 = tpu.transpose %65, [1, 0, 2] : vector<4x16x8xf32> -> vector<16x4x8xf32>
    %67 = vector.shape_cast %66 : vector<16x4x8xf32> to vector<16x32xf32>
    %68 = tpu.concatenate %36, %67 in 0 : vector<16x32xf32>, vector<16x32xf32> -> vector<32x32xf32>
    %69 = arith.truncf %68 : vector<32x32xf32> to vector<32x32xbf16>
    %cst_20 = arith.constant dense<0.000000e+00> : vector<32x32xf32>
    %70 = tpu.matmul %69, %5, %cst_20 {dimension_numbers = #tpu.dot_dimension_numbers<[1], [0], [0], [1], [0, 0, 1, 1], [], []>} : vector<32x32xbf16>, vector<32x32xbf16>, vector<32x32xf32> -> vector<32x32xf32>
    %71 = arith.addf %0, %70 : vector<32x32xf32>
    %c0_21 = arith.constant 0 : index
    %c0_22 = arith.constant 0 : index
    %72 = vector.load %arg1[%c0_21, %c0_22] : memref<32x32xbf16, #tpu.memory_space<vmem>>, vector<32x32xbf16>
    %73 = arith.truncf %71 : vector<32x32xf32> to vector<32x32xbf16>
    %cst_23 = arith.constant dense<0.000000e+00> : vector<32x32xf32>
    %74 = tpu.matmul %72, %73, %cst_23 {dimension_numbers = #tpu.dot_dimension_numbers<[1], [0], [0], [1], [0, 0, 1, 1], [], []>} : vector<32x32xbf16>, vector<32x32xbf16>, vector<32x32xf32> -> vector<32x32xf32>
    %75 = arith.subf %71, %74 : vector<32x32xf32>
    %76 = arith.truncf %75 : vector<32x32xf32> to vector<32x32xbf16>
    %c0_24 = arith.constant 0 : index
    %c0_25 = arith.constant 0 : index
    %77 = vector.load %arg3[%c0_24, %c0_25] : memref<32x128xbf16, #tpu.memory_space<vmem>>, vector<32x128xbf16>
    %cst_26 = arith.constant dense<0.000000e+00> : vector<32x128xf32>
    %78 = tpu.matmul %76, %77, %cst_26 {dimension_numbers = #tpu.dot_dimension_numbers<[1], [0], [0], [1], [0, 0, 1, 1], [], []>} : vector<32x32xbf16>, vector<32x128xbf16>, vector<32x128xf32> -> vector<32x128xf32>
    %cst_27 = arith.constant 0.000000e+00 : f32
    %79 = vector.broadcast %cst_27 : f32 to vector<32x128xf32>
    %80 = arith.maximumf %78, %79 : vector<32x128xf32>
    %81 = arith.truncf %80 : vector<32x128xf32> to vector<32x128xbf16>
    %c0_28 = arith.constant 0 : index
    %c0_29 = arith.constant 0 : index
    %82 = vector.load %arg4[%c0_28, %c0_29] : memref<128x32xbf16, #tpu.memory_space<vmem>>, vector<128x32xbf16>
    %cst_30 = arith.constant dense<0.000000e+00> : vector<32x32xf32>
    %83 = tpu.matmul %81, %82, %cst_30 {dimension_numbers = #tpu.dot_dimension_numbers<[1], [0], [0], [1], [0, 0, 1, 1], [], []>} : vector<32x128xbf16>, vector<128x32xbf16>, vector<32x32xf32> -> vector<32x32xf32>
    %84 = arith.addf %75, %83 : vector<32x32xf32>
    %85 = arith.truncf %84 : vector<32x32xf32> to vector<32x32xbf16>
    %cst_31 = arith.constant dense<0.000000e+00> : vector<32x32xf32>
    %86 = tpu.matmul %72, %85, %cst_31 {dimension_numbers = #tpu.dot_dimension_numbers<[1], [0], [0], [1], [0, 0, 1, 1], [], []>} : vector<32x32xbf16>, vector<32x32xbf16>, vector<32x32xf32> -> vector<32x32xf32>
    %87 = arith.subf %84, %86 : vector<32x32xf32>
    %c0_32 = arith.constant 0 : index
    %c0_33 = arith.constant 0 : index
    %88 = vector.load %arg5[%c0_32, %c0_33] : memref<32x32xf32, #tpu.memory_space<vmem>>, vector<32x32xf32>
    tpu.vector_store %arg5[%c0_32, %c0_33], %87 {strides = array<i32>} : memref<32x32xf32, #tpu.memory_space<vmem>>, vector<32x32xf32>,
    return
  }
}

</mosaic_0001>

<bundles_post_ra>
// kernel: tpu_custom_call.1
= control target key start
LH: loop header
LB: loop body
LE: loop exit
PB: predicated region body
PF: predicated region fallthrough
CT: control target
= control target key end

     0   :  { %12 = vsyncpa [#allocation3], 0  ;;  %vm47_vm0 = vcmask 261120   ;;  %s5049_s0 = inlined_call_operand.vmem [shape: f32[32,32], index: 0, kind: input, shape index: {}]   ;;  %s5050_s1 = inlined_call_operand.vmem [shape: bf16[32,32], index: 1, kind: input, shape index: {}]   ;;  %s5051_s2 = inlined_call_operand.vmem [shape: bf16[32,128], index: 2, kind: input, shape index: {}]   ;;  %s5052_s3 = inlined_call_operand.vmem [shape: bf16[32,128], index: 3, kind: input, shape index: {}]   ;;  %s5053_s4 = inlined_call_operand.vmem [shape: bf16[128,32], index: 4, kind: input, shape index: {}]   ;;  %s5054_s5 = inlined_call_operand.hbm [shape: f32[32,32], index: 5, kind: output, shape index: {0}]   ;;  %s5055_s6 = inlined_call_operand.hbm [shape: bf16[2,4,16,16], index: 6, kind: output, shape index: {1}]  }
   0x1   :  { %v4133_v0 = vld [vmem:[%s5051_s2 + $0x8] sm:$0xff]   ;;  %v4134_v1 = vld [vmem:[%s5051_s2] sm:$0xff]   ;;  %v27_v4 = vld [vmem:[%s5049_s0 + $0x10] sm:$0xff] }
   0x2   :  { %3929 = vmatprep.subr.bf16.mxu1 %v4133_v0  ;;  %v25_v2 = vld [vmem:[%s5049_s0] sm:$0xff]  ;;  %v26_v3 = vld [vmem:[%s5049_s0 + $0x8] sm:$0xff]  ;;  %v28_v6 = vld [vmem:[%s5049_s0 + $0x18] sm:$0xff] }
   0x3   :  { %3930 = vmatpush3.bf16.msra.mxu1 %v4133_v0  ;;  %v29_v5 = vpack.c.bf16 %v26_v3, %v25_v2  ;;  %v30_v7 = vpack.c.bf16 %v28_v6, %v27_v4 }
   0x4   :  { %3931 = vmatprep.subr.bf16.mxu1 %v4134_v1 }
   0x5   :  { %3933 = vmatprep.mubr.msk.bf16.mxu1 %vm47_vm0, %v29_v5 }
   0x7   :  { %3932 = vmatpush3.bf16.msra.mxu1 %v4134_v1 }
   0xa   :  { %3934 = vmatmul.mubr.msk.bf16.vlgmr.msra.gmra.mxu1 %vm47_vm0, %v30_v7 }
   0xb   :  { %13 = vsyncpa [#allocation5], 0  ;;  %s4261_s9 = smov 104   ;;  %s4262_s10 = smov 120   ;;  %v4266_v17 = vmov 0.0   ;;  %vm4267_vm1 = vmmov 0   ;;  %v138_v20 = vlaneseq }
   0xc   :  { %s4263_s11 = smov 96   ;;  %s4264_s12 = smov 112   ;;  %3937 = vmatprep.subr.bf16.mxu1 %v4266_v17  ;;  %3943 = vmatprep.subr.bf16.mxu0 %v4266_v17  ;;  %v4268_v18 = vmov 1983009808   ;;  %v4269_v29 = vmov 0   ;;  %vm918_vm2 = vcmask 64512  }
   0xd   :  { %s4265_s13 = smov 64   ;;  %3939 = vmatprep.mubr.msk.bf16.mxu1 %vm4267_vm1, %v4266_v17  ;;  %3945 = vmatprep.mubr.msk.bf16.mxu0 %vm4267_vm1, %v4266_v17  ;;  %v136_v19 = vunpack.c.l.s4 %v4268_v18  ;;  %v4362_v30 = vpack.i.b16 %v4269_v29, %v4269_v29  ;;  %v139_v31 = vshrl.u32 %v138_v20, 7  ;;  %v4270_v33 = vmov 1934713408   ;;  %s4271_s14 = smov 8  }
   0xe   :  { %v167_v34 = vunpack.c.l.s4 %v4270_v33  ;;  %vm1115_vm3 = vcmask 130048   ;;  %vm1236_vm4 = vcmask 125952   ;;  %s4272_s15 = smov 24   ;;  %s4273_s18 = smov 32   ;;  %vm1721_vm5 = vcmask 195584  }
   0xf   :  { %v137_v26 = vunpack.c.0.s8 %v136_v19  ;;  %s4274_s21 = smov 16  }
  0x10   :  { %v168_v51 = vunpack.c.0.s8 %v167_v34 }
  0x11   :  { %v4368_v47 = vsub.s32 %v137_v26, %v139_v31 }
  0x12   :  { %v4384_v2 = vsub.s32 %v168_v51, %v139_v31 }
  0xca   :  { %v3935_v8 = vpop.f32.mrf.mxu1 }
  0xcc   :  { %v88_v9 = vpop.f32.mrf.mxu1 }
  0xce   :  { %v3936_v10 = vpop.f32.mrf.mxu1 }
  0xcf   :  { %v4334_v11 = vpack.c.bf16 %v3936_v10, %v3935_v8 }
  0xd0   :  { %v91_v12 = vpop.f32.mrf.mxu1 }
  0xd1   :  { %v103_v13 = vpack.c.bf16 %v91_v12, %v88_v9 }
  0xd3   :  { %110 = vrot.lane.b32.xlu1 %v103_v13, %s4261_s9  ;;  %106 = vrot.lane.b32.xlu0 %v103_v13, %s4262_s10  ;;  %v116_v32 = vshrl.u32 %v103_v13, 16 }
  0xd7   :  { %378 = vrot.lane.b32.xlu1 %v103_v13, %s4263_s11  ;;  %108 = vrot.lane.b32.xlu0 %v103_v13, %s4264_s12 }
 0x145   :  { %v4337_v14 = vpop.permute.xlu0 %106  ;;  %v4341_v15 = vpop.permute.xlu1 %110 }
 0x146   :  { %380 = vrot.lane.b32.xlu0 %v4337_v14, %s4263_s11  ;;  %v125_v25 = vshrl.u32 %v4341_v15, 16  ;;  %v117_v27 = vshrl.u32 %v4337_v14, 16  ;;  %v114_v37 = vpack.i.b16 %v4337_v14, %v103_v13 }
 0x148   :  { %v118_v44 = vpack.i.b16 %v117_v27, %v116_v32  ;;  %v134_v50 = vcombine.high %v114_v37, %v4362_v30  ;;  %v141_v0 = vrot.slane %v114_v37, %v4368_v47 }
 0x149   :  { %v4343_v16 = vpop.permute.xlu0 %108  ;;  %v379_v21 = vpop.permute.xlu1 %378 }
 0x14a   :  { %384 = vrot.lane.b32.xlu0 %v4341_v15, %s4263_s11  ;;  %382 = vrot.lane.b32.xlu1 %v4343_v16, %s4263_s11  ;;  %v124_v23 = vshrl.u32 %v4343_v16, 16  ;;  %v390_v38 = vshrl.u32 %v379_v21, 16  ;;  %v122_v45 = vpack.i.b16 %v4341_v15, %v4343_v16  ;;  %v200_v57 = vcombine.high %v118_v44, %v4362_v30 }
 0x14b   :  { %v148_v1 = vrot.slane %v134_v50, %v4368_v47 }
 0x14c   :  { %v126_v39 = vpack.i.b16 %v125_v25, %v124_v23  ;;  %v149_v58 = vcombine.high %v122_v45, %v4362_v30  ;;  %v214_v8 = vrot.slane %v200_v57, %v4368_v47 }
 0x14e   :  { %1725 = vrot.lane.b32.xlu0 %v4334_v11, %s4262_s10  ;;  %1727 = vrot.lane.b32.xlu1 %v4334_v11, %s4264_s12  ;;  %v215_v52 = vcombine.high %v126_v39, %v4362_v30  ;;  %v163_v9 = vrot.slane %v149_v58, %v4368_v47  ;;  %v222_v10 = vrot.slane %v126_v39, %v4368_v47 }
 0x150   :  { %v229_v3 = vrot.slane %v215_v52, %v4368_v47  ;;  %v180_v29 = vcombine.low %v148_v1, %v163_v9  ;;  %v181_v31 = vcombine.high %v148_v1, %v163_v9 }
 0x152   :  { %1729 = vrot.lane.b32.xlu1 %v4334_v11, %s4261_s9  ;;  %v246_v23 = vcombine.low %v214_v8, %v229_v3 }
 0x156   :  { %646 = vrot.lane.b32.xlu1 %v103_v13, %s4265_s13 }
 0x1b8   :  { %v381_v22 = vpop.permute.xlu0 %380 }
 0x1b9   :  { %v388_v24 = vpack.i.b16 %v381_v22, %v379_v21  ;;  %v391_v28 = vshrl.u32 %v381_v22, 16  ;;  %v207_v21 = vrot.slane %v118_v44, %v4368_v47  ;;  %v156_v22 = vrot.slane %v122_v45, %v4368_v47 }
 0x1bb   :  { %v402_v41 = vcombine.high %v388_v24, %v4362_v30  ;;  %v392_v46 = vpack.i.b16 %v391_v28, %v390_v38  ;;  %v409_v60 = vrot.slane %v388_v24, %v4368_v47  ;;  %v247_v24 = vcombine.high %v214_v8, %v229_v3 }
 0x1bc   :  { %v383_v35 = vpop.permute.xlu1 %382  ;;  %v385_v36 = vpop.permute.xlu0 %384  ;;  %v230_v32 = vcombine.low %v207_v21, %v222_v10  ;;  %v231_v33 = vcombine.high %v207_v21, %v222_v10  ;;  %v164_v38 = vcombine.low %v141_v0, %v156_v22  ;;  %v165_v39 = vcombine.high %v141_v0, %v156_v22 }
 0x1bd   :  { %v398_v40 = vshrl.u32 %v383_v35, 16  ;;  %v396_v42 = vpack.i.b16 %v385_v36, %v383_v35  ;;  %v399_v43 = vshrl.u32 %v385_v36, 16  ;;  %v416_v53 = vrot.slane %v402_v41, %v4368_v47 }
 0x1be   :  { %v468_v59 = vcombine.high %v392_v46, %v4362_v30  ;;  %v475_v4 = vrot.slane %v392_v46, %v4368_v47  ;;  %v261_v41 = vrot.slane %v247_v24, %v4384_v2  ;;  %v188_v46 = vrot.slane %v180_v29, %v4384_v2 }
 0x1bf   :  { %v400_v48 = vpack.i.b16 %v399_v43, %v398_v40  ;;  %v417_v49 = vcombine.high %v396_v42, %v4362_v30  ;;  %v424_v54 = vrot.slane %v396_v42, %v4368_v47  ;;  %v254_v40 = vrot.slane %v246_v23, %v4384_v2 }
 0x1c0   :  { %v482_v12 = vrot.slane %v468_v59, %v4368_v47  ;;  %v245_v50 = vrot.slane %v231_v33, %v4384_v2 }
 0x1c1   :  { %v431_v55 = vrot.slane %v417_v49, %v4368_v47  ;;  %v483_v56 = vcombine.high %v400_v48, %v4362_v30  ;;  %v490_v63 = vrot.slane %v400_v48, %v4368_v47  ;;  %v432_v5 = vcombine.low %v409_v60, %v424_v54 }
 0x1c2   :  { %v433_v6 = vcombine.high %v409_v60, %v424_v54  ;;  %v195_v48 = vrot.slane %v181_v31, %v4384_v2  ;;  %v238_v49 = vrot.slane %v230_v32, %v4384_v2  ;;  %v332_v57 = vcombine.low %v254_v40, %v261_v41 }
 0x1c3   :  { %v448_v61 = vcombine.low %v416_v53, %v431_v55  ;;  %v449_v62 = vcombine.high %v416_v53, %v431_v55  ;;  %v497_v7 = vrot.slane %v483_v56, %v4368_v47  ;;  %v498_v19 = vcombine.low %v475_v4, %v490_v63 }
 0x1c4   :  { %v499_v20 = vcombine.high %v475_v4, %v490_v63  ;;  %v440_v25 = vrot.slane %v432_v5, %v4384_v2  ;;  %v447_v26 = vrot.slane %v433_v6, %v4384_v2  ;;  %v172_v55 = vrot.slane %v164_v38, %v4384_v2 }
 0x1c5   :  { %v456_v13 = vrot.slane %v448_v61, %v4384_v2  ;;  %v463_v18 = vrot.slane %v449_v62, %v4384_v2  ;;  %v514_v27 = vcombine.low %v482_v12, %v497_v7  ;;  %v515_v28 = vcombine.high %v482_v12, %v497_v7 }
 0x1c6   :  { %v506_v34 = vrot.slane %v498_v19, %v4384_v2  ;;  %v513_v35 = vrot.slane %v499_v20, %v4384_v2  ;;  %v534_v44 = vcombine.low %v440_v25, %v447_v26  ;;  %v3771_v45 = vcombine.high %v440_v25, %v447_v26 }
 0x1c7   :  { %v550_v36 = vcombine.low %v456_v13, %v463_v18  ;;  %v3772_v37 = vcombine.high %v456_v13, %v463_v18  ;;  %v522_v42 = vrot.slane %v514_v27, %v4384_v2  ;;  %v529_v43 = vrot.slane %v515_v28, %v4384_v2 }
 0x1c8   :  { %v584_v51 = vcombine.low %v506_v34, %v513_v35  ;;  %v3773_v52 = vcombine.high %v506_v34, %v513_v35  ;;  %v179_v56 = vrot.slane %v165_v39, %v4384_v2  ;;  %v3770_v58 = vcombine.high %v254_v40, %v261_v41 }
 0x1c9   :  { %v557_v53 = vrot.slane %v550_v36, %v4368_v47  ;;  %v565_v54 = vrot.slane %v3772_v37, %v4368_v47  ;;  %v541_v59 = vrot.slane %v534_v44, %v4368_v47  ;;  %v549_v60 = vrot.slane %v3771_v45, %v4368_v47 }
 0x1ca   :  { %v600_v61 = vcombine.low %v522_v42, %v529_v43  ;;  %v282_v62 = vcombine.low %v188_v46, %v195_v48  ;;  %v3768_v63 = vcombine.high %v188_v46, %v195_v48  ;;  %v316_v0 = vcombine.low %v238_v49, %v245_v50 }
 0x1cb   :  { %v3769_v1 = vcombine.high %v238_v49, %v245_v50  ;;  %v3774_v3 = vcombine.high %v522_v42, %v529_v43  ;;  %v574_v4 = vcombine.low %v557_v53, %v565_v54  ;;  %v591_v5 = vrot.slane %v584_v51, %v4368_v47 }
 0x1cc   :  { %v599_v6 = vrot.slane %v3773_v52, %v4368_v47  ;;  %v266_v7 = vcombine.low %v172_v55, %v179_v56  ;;  %v3767_v8 = vcombine.high %v172_v55, %v179_v56  ;;  %v339_v9 = vrot.slane %v332_v57, %v4368_v47 }
 0x1cd   :  { %v347_v10 = vrot.slane %v3770_v58, %v4368_v47  ;;  %v566_v12 = vcombine.low %v541_v59, %v549_v60  ;;  %v607_v13 = vrot.slane %v600_v61, %v4368_v47  ;;  %v289_v18 = vrot.slane %v282_v62, %v4368_v47 }
 0x1ce   :  { %v297_v19 = vrot.slane %v3768_v63, %v4368_v47  ;;  %v323_v20 = vrot.slane %v316_v0, %v4368_v47  ;;  %v331_v21 = vrot.slane %v3769_v1, %v4368_v47  ;;  %v581_v22 = vrot.slane %v574_v4, %v4384_v2 }
 0x1cf   :  { %v615_v23 = vrot.slane %v3774_v3, %v4368_v47  ;;  %v616_v24 = vcombine.low %v591_v5, %v599_v6  ;;  %v273_v25 = vrot.slane %v266_v7, %v4368_v47  ;;  %v281_v26 = vrot.slane %v3767_v8, %v4368_v47 }
 0x1d0   :  { %v573_v27 = vrot.slane %v566_v12, %v4384_v2  ;;  %v356_v29 = vcombine.low %v339_v9, %v347_v10  ;;  %v306_v31 = vcombine.low %v289_v18, %v297_v19  ;;  %v348_v32 = vcombine.low %v323_v20, %v331_v21 }
 0x1d1   :  { %v624_v28 = vcombine.low %v607_v13, %v615_v23  ;;  %v623_v34 = vrot.slane %v616_v24, %v4384_v2  ;;  %v298_v36 = vcombine.low %v273_v25, %v281_v26 }
 0x1d2   :  { %v582_v33 = vcombine.low %v573_v27, %v581_v22  ;;  %v363_v38 = vrot.slane %v356_v29, %v4384_v2  ;;  %v313_v39 = vrot.slane %v306_v31, %v4384_v2  ;;  %v355_v40 = vrot.slane %v348_v32, %v4384_v2 }
 0x1d3   :  { %v631_v35 = vrot.slane %v624_v28, %v4384_v2  ;;  %v305_v45 = vrot.slane %v298_v36, %v4384_v2  ;;  %v583_v50 = vcombine.high %v573_v27, %v581_v22 }
 0x1d4   :  { %v637_v42 = vshrl.u32 %v582_v33, 16  ;;  %v364_v49 = vcombine.low %v355_v40, %v363_v38  ;;  %v365_v62 = vcombine.high %v355_v40, %v363_v38 }
 0x1d5   :  { %v632_v37 = vcombine.low %v623_v34, %v631_v35  ;;  %v633_v44 = vcombine.high %v623_v34, %v631_v35  ;;  %v314_v52 = vcombine.low %v305_v45, %v313_v39  ;;  %v643_v56 = vshrl.u32 %v583_v50, 16 }
 0x1d6   :  { %v370_v55 = vshrl.u32 %v364_v49, 16  ;;  %v315_v0 = vcombine.high %v305_v45, %v313_v39  ;;  %v376_v1 = vshrl.u32 %v365_v62, 16 }
 0x1d7   :  { %v636_v41 = vpack.i.b16 %v632_v37, %v582_v33  ;;  %v638_v43 = vshrl.u32 %v632_v37, 16  ;;  %v644_v53 = vshrl.u32 %v633_v44, 16  ;;  %v642_v54 = vpack.i.b16 %v633_v44, %v583_v50  ;;  %v4481_v44 = vpop.permute.xlu0 %1725 }
 0x1d8   :  { %v368_v57 = vpack.i.b16 %v364_v49, %v314_v52  ;;  %v369_v58 = vshrl.u32 %v314_v52, 16  ;;  %v374_v3 = vpack.i.b16 %v365_v62, %v315_v0  ;;  %v375_v4 = vshrl.u32 %v315_v0, 16 }
 0x1d9   :  { %v923_v46 = vsel %vm918_vm2, %v636_v41, 0  ;;  %v639_v48 = vpack.i.b16 %v638_v43, %v637_v42  ;;  %v645_v59 = vpack.i.b16 %v644_v53, %v643_v56  ;;  %v1017_v60 = vsel %vm918_vm2, %v642_v54, 0 }
 0x1da   :  { %3938 = vmatpush3.bf16.xpose.msra.mxu1 %v923_v46  ;;  %v371_v61 = vpack.i.b16 %v370_v55, %v369_v58  ;;  %v377_v5 = vpack.i.b16 %v376_v1, %v375_v4 }
 0x1db   :  { %v970_v51 = vsel %vm918_vm2, %v639_v48, 0  ;;  %3949 = vmatprep.subr.bf16.mxu1 %v4266_v17  ;;  %v1064_v63 = vsel %vm918_vm2, %v645_v59, 0 }
 0x1dc   :  { %3944 = vmatpush3.bf16.xpose.msra.mxu0 %v970_v51 }
 0x1dd   :  { %3955 = vmatprep.subr.bf16.mxu0 %v4266_v17 }
 0x1e1   :  { %3940 = vmatmul.mubr.msk.bf16.vlgmr.msra.gmra.mxu1 %vm918_vm2, %v368_v57 }
 0x1e2   :  { %3950 = vmatpush3.bf16.xpose.msra.mxu1 %v1017_v60  ;;  %3951 = vmatprep.mubr.msk.bf16.mxu1 %vm4267_vm1, %v4266_v17 }
 0x1e3   :  { %3946 = vmatmul.mubr.msk.bf16.vlgmr.msra.gmra.mxu0 %vm918_vm2, %v371_v61  ;;  %3961 = vmatprep.subr.bf16.mxu1 %v4266_v17 }
 0x1e4   :  { %3956 = vmatpush3.bf16.xpose.msra.mxu0 %v1064_v63  ;;  %3957 = vmatprep.mubr.msk.bf16.mxu0 %vm4267_vm1, %v4266_v17 }
 0x1e5   :  { %3967 = vmatprep.subr.bf16.mxu0 %v4266_v17 }
 0x1e9   :  { %3952 = vmatmul.mubr.msk.bf16.vlgmr.msra.gmra.mxu1 %vm918_vm2, %v374_v3 }
 0x1ea   :  { %3963 = vmatprep.mubr.msk.bf16.mxu1 %vm4267_vm1, %v4266_v17 }
 0x1eb   :  { %3958 = vmatmul.mubr.msk.bf16.vlgmr.msra.gmra.mxu0 %vm918_vm2, %v377_v5 }
 0x1ec   :  { %3969 = vmatprep.mubr.msk.bf16.mxu0 %vm4267_vm1, %v4266_v17 }
 0x2a1   :  { %v959_v6 = vpop.f32.mrf.mxu1 }
 0x2a2   :  { %v1107_v7 = vmul.f32 0.35355338, %v959_v6 }
 0x2a3   :  { %v3941_v8 = vpop.f32.mrf.mxu1  ;;  %v1006_v9 = vpop.f32.mrf.mxu0 }
 0x2a4   :  { %v1109_v10 = vmul.f32 0.35355338, %v1006_v9  ;;  %v1116_v12 = vsel %vm1115_vm3, %v1107_v7, -inf }
 0x2a5   :  { %v3947_v13 = vpop.f32.mrf.mxu0  ;;  %1117 = vmax.xlane.f32.xlu1 %v1116_v12  ;;  %v962_v18 = vpop.f32.mrf.mxu1 }
 0x2a6   :  { %v1108_v19 = vmul.f32 0.35355338, %v962_v18  ;;  %v1122_v20 = vsel %vm1115_vm3, %v1109_v10, -inf }
 0x2a7   :  { %1123 = vmax.xlane.f32.xlu0 %v1122_v20  ;;  %v3942_v21 = vpop.f32.mrf.mxu1  ;;  %v1009_v22 = vpop.f32.mrf.mxu0 }
 0x2a8   :  { %v1110_v23 = vmul.f32 0.35355338, %v1009_v22  ;;  %v1119_v28 = vsel %vm1115_vm3, %v1108_v19, -inf }
 0x2a9   :  { %v3948_v24 = vpop.f32.mrf.mxu0  ;;  %v1053_v25 = vpop.f32.mrf.mxu1 }
 0x2aa   :  { %v1111_v26 = vmul.f32 0.35355338, %v1053_v25  ;;  %v1125_v27 = vsel %vm1115_vm3, %v1110_v23, -inf }
 0x2ab   :  { %v1100_v29 = vpop.f32.mrf.mxu0  ;;  %1126 = vmax.xlane.f32.xlu1 %v1125_v27  ;;  %1120 = vmax.xlane.f32.xlu0 %v1119_v28  ;;  %v3953_v31 = vpop.f32.mrf.mxu1 }
 0x2ac   :  { %v1113_v34 = vmul.f32 0.35355338, %v1100_v29  ;;  %v1128_v35 = vsel %vm1115_vm3, %v1111_v26, -inf }
 0x2ad   :  { %v1056_v32 = vpop.f32.mrf.mxu1  ;;  %v3959_v33 = vpop.f32.mrf.mxu0 }
 0x2ae   :  { %v1134_v39 = vsel %vm1115_vm3, %v1113_v34, -inf  ;;  %v4467_v40 = vmul.f32 0.35355338, %v1056_v32 }
 0x2af   :  { %v1103_v36 = vpop.f32.mrf.mxu0  ;;  %1129 = vmax.xlane.f32.xlu0 %v1128_v35  ;;  %v3954_v37 = vpop.f32.mrf.mxu1 }
 0x2b0   :  { %v4469_v41 = vmul.f32 0.35355338, %v1103_v36  ;;  %v1131_v42 = vsel %vm1115_vm3, %v4467_v40, -inf }
 0x2b1   :  { %v3960_v38 = vpop.f32.mrf.mxu0 }
 0x2b2   :  { %v1137_v43 = vsel %vm1115_vm3, %v4469_v41, -inf }
 0x2b3   :  { %1135 = vmax.xlane.f32.xlu0 %v1134_v39 }
 0x2bc   :  { %650 = vrot.lane.b32.xlu1 %v4343_v16, %s4265_s13  ;;  %v4477_v16 = vpop.permute.xlu1 %1727 }
 0x2c0   :  { %652 = vrot.lane.b32.xlu1 %v4341_v15, %s4265_s13  ;;  %v4479_v15 = vpop.permute.xlu1 %1729 }
 0x2c9   :  { %648 = vrot.lane.b32.xlu0 %v4337_v14, %s4265_s13  ;;  %v647_v14 = vpop.permute.xlu1 %646 }
 0x2ca   :  { %v658_v9 = vshrl.u32 %v647_v14, 16 }
 0x2e4   :  { %1132 = vmax.xlane.f32.xlu1 %v1131_v42 }
 0x2e8   :  { %1138 = vmax.xlane.f32.xlu1 %v1137_v43 }
 0x2f9   :  { %1991 = vrot.lane.b32.xlu1 %v4334_v11, %s4263_s11 }
 0x32e   :  { %v1118_v45 = vpop.xlane.xlu1 %1117 }
 0x32f   :  { %v1140_v46 = vsub.f32 %v1107_v7, %v1118_v45 }
 0x330   :  { %v1124_v48 = vpop.xlane.xlu0 %1123 }
 0x331   :  { %v1148_v49 = vmul.f32 1.442695, %v1140_v46  ;;  %v1142_v50 = vsub.f32 %v1109_v10, %v1124_v48 }
 0x333   :  { %4147 = vpow2.f32 %v1148_v49  ;;  %v1152_v51 = vmul.f32 1.442695, %v1142_v50 }
 0x334   :  { %v1127_v52 = vpop.xlane.xlu1 %1126  ;;  %v1121_v53 = vpop.xlane.xlu0 %1120 }
 0x335   :  { %4149 = vpow2.f32 %v1152_v51  ;;  %v1143_v54 = vsub.f32 %v1110_v23, %v1127_v52  ;;  %v1141_v55 = vsub.f32 %v1108_v19, %v1121_v53 }
 0x337   :  { %v1154_v56 = vmul.f32 1.442695, %v1143_v54  ;;  %v1150_v57 = vmul.f32 1.442695, %v1141_v55 }
 0x338   :  { %v651_v58 = vpop.permute.xlu1 %650  ;;  %v1130_v59 = vpop.xlane.xlu0 %1129 }
 0x339   :  { %4151 = vpow2.f32 %v1154_v56  ;;  %v1144_v60 = vsub.f32 %v1111_v26, %v1130_v59  ;;  %v666_v0 = vshrl.u32 %v651_v58, 16 }
 0x33a   :  { %4153 = vpow2.f32 %v1150_v57 }
 0x33b   :  { %v1156_v61 = vmul.f32 1.442695, %v1144_v60 }
 0x33c   :  { %v653_v62 = vpop.permute.xlu1 %652  ;;  %v1136_v63 = vpop.xlane.xlu0 %1135 }
 0x33d   :  { %v664_v1 = vpack.i.b16 %v653_v62, %v651_v58  ;;  %v667_v3 = vshrl.u32 %v653_v62, 16  ;;  %v1146_v4 = vsub.f32 %v1113_v34, %v1136_v63  ;;  %4155 = vpow2.f32 %v1156_v61 }
 0x33f   :  { %v668_v5 = vpack.i.b16 %v667_v3, %v666_v0  ;;  %v1160_v6 = vmul.f32 1.442695, %v1146_v4  ;;  %v685_v10 = vcombine.high %v664_v1, %v4362_v30  ;;  %v692_v21 = vrot.slane %v664_v1, %v4368_v47 }
 0x340   :  { %v4483_v7 = vpop.eup %4147  ;;  %v649_v8 = vpop.permute.xlu0 %648 }
 0x341   :  { %4157 = vpow2.f32 %v1160_v6  ;;  %v656_v13 = vpack.i.b16 %v649_v8, %v647_v14  ;;  %v659_v18 = vshrl.u32 %v649_v8, 16  ;;  %v1164_v19 = vsel %vm1115_vm3, %v4483_v7, 0.0 }
 0x342   :  { %v4486_v12 = vpop.eup %4149  ;;  %v751_v20 = vcombine.high %v668_v5, %v4362_v30  ;;  %1165 = vadd.xlane.f32.xlu0 %v1164_v19  ;;  %v699_v25 = vrot.slane %v685_v10, %v4368_v47  ;;  %v758_v34 = vrot.slane %v668_v5, %v4368_v47 }
 0x343   :  { %v660_v22 = vpack.i.b16 %v659_v18, %v658_v9  ;;  %v670_v23 = vcombine.high %v656_v13, %v4362_v30  ;;  %v677_v24 = vrot.slane %v656_v13, %v4368_v47  ;;  %v1170_v26 = vsel %vm1115_vm3, %v4486_v12, 0.0 }
 0x344   :  { %v765_v35 = vrot.slane %v751_v20, %v4368_v47 }
 0x345   :  { %v684_v28 = vrot.slane %v670_v23, %v4368_v47  ;;  %v700_v29 = vcombine.low %v677_v24, %v692_v21  ;;  %v701_v31 = vcombine.high %v677_v24, %v692_v21  ;;  %v736_v32 = vcombine.high %v660_v22, %v4362_v30 }
 0x346   :  { %v4497_v27 = vpop.eup %4151  ;;  %v743_v36 = vrot.slane %v660_v22, %v4368_v47  ;;  %1171 = vadd.xlane.f32.xlu0 %v1170_v26 }
 0x347   :  { %v4501_v33 = vpop.eup %4153  ;;  %v1173_v37 = vsel %vm1115_vm3, %v4497_v27, 0.0  ;;  %v708_v38 = vrot.slane %v700_v29, %v4384_v2  ;;  %v715_v39 = vrot.slane %v701_v31, %v4384_v2  ;;  %v716_v42 = vcombine.low %v684_v28, %v699_v25 }
 0x348   :  { %v717_v43 = vcombine.high %v684_v28, %v699_v25  ;;  %v750_v14 = vrot.slane %v736_v32, %v4368_v47  ;;  %v766_v45 = vcombine.low %v743_v36, %v758_v34  ;;  %v767_v46 = vcombine.high %v743_v36, %v758_v34 }
 0x349   :  { %v1167_v48 = vsel %vm1115_vm3, %v4501_v33, 0.0  ;;  %v724_v49 = vrot.slane %v716_v42, %v4384_v2  ;;  %v802_v51 = vcombine.low %v708_v38, %v715_v39  ;;  %v3775_v52 = vcombine.high %v708_v38, %v715_v39 }
 0x34a   :  { %v731_v50 = vrot.slane %v717_v43, %v4384_v2  ;;  %1168 = vadd.xlane.f32.xlu1 %v1167_v48  ;;  %v4515_v53 = vpop.eup %4155  ;;  %v774_v54 = vrot.slane %v766_v45, %v4384_v2  ;;  %v781_v55 = vrot.slane %v767_v46, %v4384_v2  ;;  %v782_v56 = vcombine.low %v750_v14, %v765_v35 }
 0x34b   :  { %v783_v57 = vcombine.high %v750_v14, %v765_v35  ;;  %1174 = vadd.xlane.f32.xlu0 %v1173_v37  ;;  %v809_v58 = vrot.slane %v802_v51, %v4368_v47  ;;  %v817_v59 = vrot.slane %v3775_v52, %v4368_v47  ;;  %v1176_v5 = vsel %vm1115_vm3, %v4515_v53, 0.0 }
 0x34c   :  { %v818_v60 = vcombine.low %v724_v49, %v731_v50  ;;  %v3776_v61 = vcombine.high %v724_v49, %v731_v50  ;;  %v790_v62 = vrot.slane %v782_v56, %v4384_v2  ;;  %v852_v0 = vcombine.low %v774_v54, %v781_v55 }
 0x34d   :  { %v797_v63 = vrot.slane %v783_v57, %v4384_v2  ;;  %v3777_v1 = vcombine.high %v774_v54, %v781_v55  ;;  %v834_v6 = vcombine.low %v809_v58, %v817_v59 }
 0x34e   :  { %v825_v3 = vrot.slane %v818_v60, %v4368_v47  ;;  %v833_v4 = vrot.slane %v3776_v61, %v4368_v47  ;;  %v4527_v8 = vpop.eup %4157  ;;  %v859_v9 = vrot.slane %v852_v0, %v4368_v47 }
 0x34f   :  { %v867_v10 = vrot.slane %v3777_v1, %v4368_v47  ;;  %v868_v13 = vcombine.low %v790_v62, %v797_v63  ;;  %v3778_v18 = vcombine.high %v790_v62, %v797_v63  ;;  %1177 = vadd.xlane.f32.xlu0 %v1176_v5  ;;  %v1182_v23 = vsel %vm1115_vm3, %v4527_v8, 0.0 }
 0x350   :  { %v842_v19 = vcombine.low %v825_v3, %v833_v4  ;;  %v841_v24 = vrot.slane %v834_v6, %v4384_v2 }
 0x351   :  { %v875_v20 = vrot.slane %v868_v13, %v4368_v47  ;;  %v883_v21 = vrot.slane %v3778_v18, %v4368_v47  ;;  %v884_v22 = vcombine.low %v859_v9, %v867_v10 }
 0x352   :  { %v849_v25 = vrot.slane %v842_v19, %v4384_v2 }
 0x353   :  { %1183 = vadd.xlane.f32.xlu0 %v1182_v23  ;;  %v892_v26 = vcombine.low %v875_v20, %v883_v21  ;;  %v891_v31 = vrot.slane %v884_v22, %v4384_v2  ;;  %v1744_v23 = vshrl.u32 %v4479_v15, 16 }
 0x354   :  { %v850_v28 = vcombine.low %v841_v24, %v849_v25  ;;  %v4537_v29 = vcombine.high %v841_v24, %v849_v25  ;;  %v1736_v24 = vshrl.u32 %v4481_v44, 16  ;;  %v1743_v25 = vshrl.u32 %v4477_v16, 16 }
 0x355   :  { %v899_v32 = vrot.slane %v892_v26, %v4384_v2  ;;  %v1741_v26 = vpack.i.b16 %v4479_v15, %v4477_v16 }
 0x356   :  { %v906_v36 = vshrl.u32 %v850_v28, 16  ;;  %v914_v37 = vshrl.u32 %v4537_v29, 16 }
 0x357   :  { %v900_v34 = vcombine.low %v891_v31, %v899_v32  ;;  %v4541_v35 = vcombine.high %v891_v31, %v899_v32  ;;  %v1762_v32 = vcombine.high %v1741_v26, %v4362_v30 }
 0x359   :  { %v904_v38 = vpack.i.b16 %v900_v34, %v850_v28  ;;  %v907_v39 = vshrl.u32 %v900_v34, 16  ;;  %v912_v42 = vpack.i.b16 %v4541_v35, %v4537_v29  ;;  %v915_v43 = vshrl.u32 %v4541_v35, 16 }
 0x35a   :  { %v1735_v28 = vshrl.u32 %v4334_v11, 16  ;;  %v1745_v29 = vpack.i.b16 %v1744_v23, %v1743_v25 }
 0x35b   :  { %3962 = vmatpush3.bf16.msra.mxu1 %v904_v38  ;;  %v908_v14 = vpack.i.b16 %v907_v39, %v906_v36  ;;  %v916_v45 = vpack.i.b16 %v915_v43, %v914_v37  ;;  %v1776_v37 = vrot.slane %v1762_v32, %v4368_v47  ;;  %v1769_v39 = vrot.slane %v1741_v26, %v4368_v47 }
 0x35c   :  { %3973 = vmatprep.subr.bf16.mxu1 %v4266_v17  ;;  %v1737_v31 = vpack.i.b16 %v1736_v24, %v1735_v28  ;;  %v1828_v35 = vcombine.high %v1745_v29, %v4362_v30  ;;  %v1835_v38 = vrot.slane %v1745_v29, %v4368_v47 }
 0x35d   :  { %3968 = vmatpush3.bf16.msra.mxu0 %v908_v14 }
 0x35e   :  { %3979 = vmatprep.subr.bf16.mxu0 %v4266_v17  ;;  %v1813_v36 = vcombine.high %v1737_v31, %v4362_v30  ;;  %v1820_v43 = vrot.slane %v1737_v31, %v4368_v47  ;;  %v1842_v14 = vrot.slane %v1828_v35, %v4368_v47 }
 0x36d   :  { %v1133_v46 = vpop.xlane.xlu1 %1132 }
 0x36e   :  { %v1145_v48 = vsub.f32 %v4467_v40, %v1133_v46  ;;  %v1827_v46 = vrot.slane %v1813_v36, %v4368_v47 }
 0x370   :  { %v1158_v49 = vmul.f32 1.442695, %v1145_v48 }
 0x371   :  { %v1139_v50 = vpop.xlane.xlu1 %1138 }
 0x372   :  { %4159 = vpow2.f32 %v1158_v49  ;;  %v1147_v51 = vsub.f32 %v4469_v41, %v1139_v50  ;;  %v1843_v50 = vcombine.low %v1820_v43, %v1835_v38 }
 0x374   :  { %v1162_v52 = vmul.f32 1.442695, %v1147_v51  ;;  %v1844_v51 = vcombine.high %v1820_v43, %v1835_v38 }
 0x375   :  { %v4565_v41 = vpop.permute.xlu1 %1991 }
 0x376   :  { %4161 = vpow2.f32 %v1162_v52 }
 0x37f   :  { %v4551_v54 = vpop.eup %4159 }
 0x380   :  { %v1179_v55 = vsel %vm1115_vm3, %v4551_v54, 0.0 }
 0x381   :  { %1180 = vadd.xlane.f32.xlu1 %v1179_v55 }
 0x383   :  { %v4555_v56 = vpop.eup %4161 }
 0x384   :  { %v1185_v57 = vsel %vm1115_vm3, %v4555_v56, 0.0 }
 0x385   :  { %1186 = vadd.xlane.f32.xlu0 %v1185_v57  ;;  %v1859_v57 = vcombine.low %v1827_v46, %v1842_v14 }
 0x392   :  { %1995 = vrot.lane.b32.xlu1 %v4477_v16, %s4263_s11 }
 0x396   :  { %1997 = vrot.lane.b32.xlu1 %v4479_v15, %s4263_s11 }
 0x39b   :  { %1993 = vrot.lane.b32.xlu0 %v4481_v44, %s4263_s11 }
 0x3cb   :  { %v1166_v40 = vpop.xlane.xlu0 %1165 }
 0x3cc   :  { %4163 = vrcp.f32 %v1166_v40  ;;  %v1860_v40 = vcombine.high %v1827_v46, %v1842_v14 }
 0x3cf   :  { %v1172_v58 = vpop.xlane.xlu0 %1171 }
 0x3d0   :  { %4165 = vrcp.f32 %v1172_v58 }
 0x3d3   :  { %v1169_v59 = vpop.xlane.xlu1 %1168 }
 0x3d4   :  { %4167 = vrcp.f32 %v1169_v59  ;;  %v1175_v60 = vpop.xlane.xlu0 %1174 }
 0x3d5   :  { %4169 = vrcp.f32 %v1175_v60 }
 0x3d8   :  { %v1178_v61 = vpop.xlane.xlu0 %1177 }
 0x3d9   :  { %4171 = vrcp.f32 %v1178_v61  ;;  %v4164_v62 = vpop.eup %4163  ;;  %v1851_v61 = vrot.slane %v1843_v50, %v4384_v2 }
 0x3da   :  { %v1196_v63 = vmul.f32 %v4164_v62, %v4483_v7  ;;  %v1858_v62 = vrot.slane %v1844_v51, %v4384_v2 }
 0x3dc   :  { %v1184_v0 = vpop.xlane.xlu0 %1183  ;;  %v3851_v1 = vpack.c.bf16 %v1196_v63, %v1196_v63 }
 0x3dd   :  { %4173 = vrcp.f32 %v1184_v0  ;;  %v4166_v3 = vpop.eup %4165 }
 0x3de   :  { %1237 = vst.msk [vmem:[#allocation4] sm:$0xf] %vm1236_vm4, %v3851_v1  ;;  %v1198_v4 = vmul.f32 %v4166_v3, %v4486_v12  ;;  %v1867_v1 = vrot.slane %v1859_v57, %v4384_v2  ;;  %v1874_v3 = vrot.slane %v1860_v40, %v4384_v2 }
 0x3e0   :  { %v3853_v6 = vpack.c.bf16 %v1198_v4, %v1198_v4  ;;  %v3802_v29 = vcombine.high %v1867_v1, %v1874_v3 }
 0x3e1   :  { %v4168_v5 = vpop.eup %4167 }
 0x3e2   :  { %v4170_v9 = vpop.eup %4169  ;;  %v1197_v10 = vmul.f32 %v4168_v5, %v4501_v33  ;;  %1239 = vst.msk [vmem:[#allocation4 + $0x8] sm:$0xf] %vm1236_vm4, %v3853_v6  ;;  %v4659_v51 = vrot.slane %v3802_v29, %v4368_v47 }
 0x3e3   :  { %v1199_v13 = vmul.f32 %v4170_v9, %v4497_v27 }
 0x3e4   :  { %v1204_v18 = vpack.c.bf16 %v1197_v10, %v1196_v63  ;;  %v3852_v7 = vpack.c.bf16 %v1197_v10, %v1197_v10  ;;  %v1929_v10 = vcombine.low %v1851_v61, %v1858_v62 }
 0x3e5   :  { %v1205_v19 = vpack.c.bf16 %v1199_v13, %v1198_v4  ;;  %v3854_v20 = vpack.c.bf16 %v1199_v13, %v1199_v13 }
 0x3e6   :  { %v4172_v21 = vpop.eup %4171  ;;  %1238 = vst.msk [vmem:[#allocation4 + $0x4] sm:$0xf] %vm1236_vm4, %v3852_v7  ;;  %3964 = vmatmul.mubr.msk.bf16.vlgmr.msra.gmra.mxu1 %vm1115_vm3, %v1204_v18  ;;  %v3801_v7 = vcombine.high %v1851_v61, %v1858_v62 }
 0x3e7   :  { %3974 = vmatpush3.bf16.msra.mxu1 %v912_v42  ;;  %1240 = vst.msk [vmem:[#allocation4 + $0xc] sm:$0xf] %vm1236_vm4, %v3854_v20  ;;  %3970 = vmatmul.mubr.msk.bf16.vlgmr.msra.gmra.mxu0 %vm1115_vm3, %v1205_v19  ;;  %v4578_v12 = vmul.f32 %v4172_v21, %v4515_v53  ;;  %v1945_v19 = vcombine.low %v1867_v1, %v1874_v3  ;;  %v2003_v20 = vshrl.u32 %v4565_v41, 16 }
 0x3e8   :  { %3980 = vmatpush3.bf16.msra.mxu0 %v916_v45  ;;  %3975 = vmatprep.mubr.msk.bf16.mxu1 %vm4267_vm1, %v4266_v17 }
 0x3e9   :  { %v3855_v27 = vpack.c.bf16 %v4578_v12, %v4578_v12  ;;  %3981 = vmatprep.mubr.msk.bf16.mxu0 %vm4267_vm1, %v4266_v17  ;;  %3985 = vmatprep.subr.bf16.mxu1 %v4266_v17  ;;  %v4648_v36 = vrot.slane %v1945_v19, %v4368_v47 }
 0x3ea   :  { %v4174_v33 = vpop.eup %4173  ;;  %3991 = vmatprep.subr.bf16.mxu0 %v4266_v17 }
 0x3eb   :  { %1241 = vst.msk [vmem:[#allocation4 + $0x10] sm:$0xf] %vm1236_vm4, %v3855_v27  ;;  %v4590_v53 = vmul.f32 %v4174_v33, %v4527_v8  ;;  %v1733_v8 = vpack.i.b16 %v4481_v44, %v4334_v11 }
 0x3ed   :  { %v3857_v22 = vpack.c.bf16 %v4590_v53, %v4590_v53  ;;  %v1747_v34 = vcombine.high %v1733_v8, %v4362_v30  ;;  %v1754_v45 = vrot.slane %v1733_v8, %v4368_v47  ;;  %v4640_v8 = vrot.slane %v1929_v10, %v4368_v47 }
 0x3ef   :  { %1243 = vst.msk [vmem:[#allocation4 + $0x18] sm:$0xf] %vm1236_vm4, %v3857_v22  ;;  %v1761_v42 = vrot.slane %v1747_v34, %v4368_v47  ;;  %v1777_v52 = vcombine.low %v1754_v45, %v1769_v39  ;;  %v1778_v55 = vcombine.high %v1754_v45, %v1769_v39 }
 0x3f1   :  { %v1793_v48 = vcombine.low %v1761_v42, %v1776_v37  ;;  %v1794_v49 = vcombine.high %v1761_v42, %v1776_v37  ;;  %v4620_v63 = vrot.slane %v1777_v52, %v4384_v2  ;;  %v4623_v0 = vrot.slane %v1778_v55, %v4384_v2 }
 0x3f3   :  { %v1801_v59 = vrot.slane %v1793_v48, %v4384_v2  ;;  %v1808_v60 = vrot.slane %v1794_v49, %v4384_v2  ;;  %v1879_v13 = vcombine.low %v4620_v63, %v4623_v0  ;;  %v3799_v18 = vcombine.high %v4620_v63, %v4623_v0 }
 0x3f5   :  { %v1895_v6 = vcombine.low %v1801_v59, %v1808_v60  ;;  %v3800_v9 = vcombine.high %v1801_v59, %v1808_v60 }
 0x3f7   :  { %v4634_v26 = vrot.slane %v1895_v6, %v4368_v47  ;;  %v4637_v28 = vrot.slane %v3800_v9, %v4368_v47 }
 0x3f9   :  { %v1919_v63 = vcombine.low %v4634_v26, %v4637_v28 }
 0x40a   :  { %v1181_v58 = vpop.xlane.xlu1 %1180 }
 0x40b   :  { %4175 = vrcp.f32 %v1181_v58 }
 0x40e   :  { %v1187_v4 = vpop.xlane.xlu0 %1186  ;;  %v1996_v5 = vpop.permute.xlu1 %1995 }
 0x40f   :  { %4177 = vrcp.f32 %v1187_v4  ;;  %v2011_v21 = vshrl.u32 %v1996_v5, 16 }
 0x412   :  { %v1994_v27 = vpop.permute.xlu0 %1993  ;;  %v1998_v33 = vpop.permute.xlu1 %1997 }
 0x413   :  { %v2001_v22 = vpack.i.b16 %v1994_v27, %v4565_v41  ;;  %v2004_v23 = vshrl.u32 %v1994_v27, 16  ;;  %v2009_v24 = vpack.i.b16 %v1998_v33, %v1996_v5  ;;  %v2012_v25 = vshrl.u32 %v1998_v33, 16 }
 0x414   :  { %v4645_v41 = vrot.slane %v3801_v7, %v4368_v47 }
 0x415   :  { %v2005_v31 = vpack.i.b16 %v2004_v23, %v2003_v20  ;;  %v2015_v32 = vcombine.high %v2001_v22, %v4362_v30  ;;  %v2022_v34 = vrot.slane %v2001_v22, %v4368_v47  ;;  %v2013_v35 = vpack.i.b16 %v2012_v25, %v2011_v21 }
 0x416   :  { %v2030_v37 = vcombine.high %v2009_v24, %v4362_v30  ;;  %v2037_v38 = vrot.slane %v2009_v24, %v4368_v47  ;;  %v1961_v0 = vcombine.low %v4640_v8, %v4645_v41 }
 0x417   :  { %v2029_v39 = vrot.slane %v2015_v32, %v4368_v47  ;;  %v2081_v42 = vcombine.high %v2005_v31, %v4362_v30  ;;  %v2088_v43 = vrot.slane %v2005_v31, %v4368_v47  ;;  %v2096_v14 = vcombine.high %v2013_v35, %v4362_v30 }
 0x418   :  { %v4176_v45 = vpop.eup %4175  ;;  %v2044_v46 = vrot.slane %v2030_v37, %v4368_v47  ;;  %v2045_v48 = vcombine.low %v2022_v34, %v2037_v38  ;;  %v2046_v49 = vcombine.high %v2022_v34, %v2037_v38  ;;  %v2103_v50 = vrot.slane %v2013_v35, %v4368_v47 }
 0x419   :  { %v2095_v52 = vrot.slane %v2081_v42, %v4368_v47  ;;  %v2110_v55 = vrot.slane %v2096_v14, %v4368_v47  ;;  %v1201_v57 = vmul.f32 %v4176_v45, %v4551_v54  ;;  %v1886_v45 = vrot.slane %v1879_v13, %v4368_v47 }
 0x41a   :  { %v2053_v40 = vrot.slane %v2045_v48, %v4384_v2  ;;  %v2060_v58 = vrot.slane %v2046_v49, %v4384_v2  ;;  %v2061_v59 = vcombine.low %v2029_v39, %v2044_v46  ;;  %v2062_v60 = vcombine.high %v2029_v39, %v2044_v46 }
 0x41b   :  { %v2111_v61 = vcombine.low %v2088_v43, %v2103_v50  ;;  %v2112_v62 = vcombine.high %v2088_v43, %v2103_v50  ;;  %v2127_v1 = vcombine.low %v2095_v52, %v2110_v55  ;;  %v2128_v3 = vcombine.high %v2095_v52, %v2110_v55 }
 0x41c   :  { %v2069_v4 = vrot.slane %v2061_v59, %v4384_v2  ;;  %v2076_v5 = vrot.slane %v2062_v60, %v4384_v2  ;;  %v2147_v6 = vcombine.low %v2053_v40, %v2060_v58  ;;  %v3803_v9 = vcombine.high %v2053_v40, %v2060_v58  ;;  %v4178_v10 = vpop.eup %4177 }
 0x41d   :  { %v2119_v7 = vrot.slane %v2111_v61, %v4384_v2  ;;  %v2126_v54 = vrot.slane %v2112_v62, %v4384_v2  ;;  %v2135_v19 = vrot.slane %v2127_v1, %v4384_v2  ;;  %v2142_v20 = vrot.slane %v2128_v3, %v4384_v2 }
 0x41e   :  { %v2154_v21 = vrot.slane %v2147_v6, %v4368_v47  ;;  %v2162_v27 = vrot.slane %v3803_v9, %v4368_v47  ;;  %v2163_v33 = vcombine.low %v2069_v4, %v2076_v5  ;;  %v3804_v22 = vcombine.high %v2069_v4, %v2076_v5 }
 0x41f   :  { %v2197_v23 = vcombine.low %v2119_v7, %v2126_v54  ;;  %v3805_v24 = vcombine.high %v2119_v7, %v2126_v54  ;;  %v2213_v25 = vcombine.low %v2135_v19, %v2142_v20  ;;  %v3806_v29 = vcombine.high %v2135_v19, %v2142_v20 }
 0x420   :  { %v1206_v31 = vpack.c.bf16 %v1201_v57, %v4578_v12  ;;  %v3856_v32 = vpack.c.bf16 %v1201_v57, %v1201_v57  ;;  %v1203_v34 = vmul.f32 %v4178_v10, %v4555_v56  ;;  %v2170_v35 = vrot.slane %v2163_v33, %v4368_v47 }
 0x421   :  { %v2178_v37 = vrot.slane %v3804_v22, %v4368_v47  ;;  %v2179_v38 = vcombine.low %v2154_v21, %v2162_v27  ;;  %v2204_v39 = vrot.slane %v2197_v23, %v4368_v47  ;;  %v2212_v42 = vrot.slane %v3805_v24, %v4368_v47 }
 0x422   :  { %1242 = vst.msk [vmem:[#allocation4 + $0x14] sm:$0xf] %vm1236_vm4, %v3856_v32  ;;  %3976 = vmatmul.mubr.msk.bf16.vlgmr.msra.gmra.mxu1 %vm1115_vm3, %v1206_v31  ;;  %v1207_v43 = vpack.c.bf16 %v1203_v34, %v4590_v53  ;;  %v3858_v14 = vpack.c.bf16 %v1203_v34, %v1203_v34  ;;  %v2220_v12 = vrot.slane %v2213_v25, %v4368_v47 }
 0x423   :  { %v2228_v56 = vrot.slane %v3806_v29, %v4368_v47  ;;  %v1894_v46 = vrot.slane %v3799_v18, %v4368_v47  ;;  %v2187_v48 = vcombine.low %v2170_v35, %v2178_v37  ;;  %v2229_v49 = vcombine.low %v2204_v39, %v2212_v42  ;;  %3987 = vmatprep.mubr.msk.bf16.mxu1 %vm4267_vm1, %v4266_v17 }
 0x424   :  { %1244 = vst.msk [vmem:[#allocation4 + $0x1c] sm:$0xf] %vm1236_vm4, %v3858_v14  ;;  %3982 = vmatmul.mubr.msk.bf16.vlgmr.msra.gmra.mxu0 %vm1115_vm3, %v1207_v43  ;;  %v1969_v50 = vcombine.low %v4648_v36, %v4659_v51  ;;  %v2186_v13 = vrot.slane %v2179_v38, %v4384_v2  ;;  %v1926_v58 = vrot.slane %v1919_v63, %v4384_v2 }
 0x425   :  { %v2237_v53 = vcombine.low %v2220_v12, %v2228_v56  ;;  %v2194_v52 = vrot.slane %v2187_v48, %v4384_v2  ;;  %3993 = vmatprep.mubr.msk.bf16.mxu0 %vm4267_vm1, %v4266_v17  ;;  %v2236_v18 = vrot.slane %v2229_v49, %v4384_v2  ;;  %v1911_v57 = vcombine.low %v1886_v45, %v1894_v46 }
 0x426   :  { %v1976_v51 = vrot.slane %v1969_v50, %v4384_v2  ;;  %v1968_v59 = vrot.slane %v1961_v0, %v4384_v2 }
 0x427   :  { %v2244_v55 = vrot.slane %v2237_v53, %v4384_v2  ;;  %v2195_v40 = vcombine.low %v2186_v13, %v2194_v52  ;;  %v1918_v41 = vrot.slane %v1911_v57, %v4384_v2  ;;  %v2196_v3 = vcombine.high %v2186_v13, %v2194_v52 }
 0x428   :  { %v1977_v1 = vcombine.low %v1968_v59, %v1976_v51  ;;  %v1978_v33 = vcombine.high %v1968_v59, %v1976_v51 }
 0x429   :  { %v2245_v36 = vcombine.low %v2236_v18, %v2244_v55  ;;  %v2250_v28 = vshrl.u32 %v2195_v40, 16  ;;  %v2246_v8 = vcombine.high %v2236_v18, %v2244_v55  ;;  %v1927_v5 = vcombine.low %v1918_v41, %v1926_v58 }
 0x42a   :  { %v1983_v10 = vshrl.u32 %v1977_v1, 16  ;;  %v2256_v7 = vshrl.u32 %v2196_v3, 16  ;;  %v1928_v23 = vcombine.high %v1918_v41, %v1926_v58  ;;  %v1989_v24 = vshrl.u32 %v1978_v33, 16 }
 0x42b   :  { %v2249_v26 = vpack.i.b16 %v2245_v36, %v2195_v40  ;;  %v2251_v60 = vshrl.u32 %v2245_v36, 16  ;;  %v2257_v6 = vshrl.u32 %v2246_v8, 16  ;;  %v2255_v9 = vpack.i.b16 %v2246_v8, %v2196_v3 }
 0x42c   :  { %v1981_v54 = vpack.i.b16 %v1977_v1, %v1927_v5  ;;  %v1982_v19 = vshrl.u32 %v1927_v5, 16  ;;  %v1987_v25 = vpack.i.b16 %v1978_v33, %v1928_v23  ;;  %v1988_v29 = vshrl.u32 %v1928_v23, 16 }
 0x42d   :  { %v2535_v61 = vsel %vm918_vm2, %v2249_v26, 0  ;;  %v2252_v62 = vpack.i.b16 %v2251_v60, %v2250_v28  ;;  %v2258_v20 = vpack.i.b16 %v2257_v6, %v2256_v7  ;;  %v2629_v21 = vsel %vm918_vm2, %v2255_v9, 0 }
 0x42e   :  { %3986 = vmatpush3.bf16.xpose.msra.mxu1 %v2535_v61  ;;  %v1984_v27 = vpack.i.b16 %v1983_v10, %v1982_v19  ;;  %v1990_v31 = vpack.i.b16 %v1989_v24, %v1988_v29 }
 0x42f   :  { %v2582_v4 = vsel %vm918_vm2, %v2252_v62, 0  ;;  %3997 = vmatprep.subr.bf16.mxu1 %v4266_v17  ;;  %v2676_v22 = vsel %vm918_vm2, %v2258_v20, 0 }
 0x430   :  { %3992 = vmatpush3.bf16.xpose.msra.mxu0 %v2582_v4 }
 0x431   :  { %4003 = vmatprep.subr.bf16.mxu0 %v4266_v17 }
 0x435   :  { %3988 = vmatmul.mubr.msk.bf16.vlgmr.msra.gmra.mxu1 %vm918_vm2, %v1981_v54 }
 0x436   :  { %3998 = vmatpush3.bf16.xpose.msra.mxu1 %v2629_v21  ;;  %3999 = vmatprep.mubr.msk.bf16.mxu1 %vm4267_vm1, %v4266_v17 }
 0x437   :  { %3994 = vmatmul.mubr.msk.bf16.vlgmr.msra.gmra.mxu0 %vm918_vm2, %v1984_v27  ;;  %4009 = vmatprep.subr.bf16.mxu1 %v4266_v17 }
 0x438   :  { %4004 = vmatpush3.bf16.xpose.msra.mxu0 %v2676_v22  ;;  %4005 = vmatprep.mubr.msk.bf16.mxu0 %vm4267_vm1, %v4266_v17 }
 0x439   :  { %4015 = vmatprep.subr.bf16.mxu0 %v4266_v17 }
 0x43d   :  { %4000 = vmatmul.mubr.msk.bf16.vlgmr.msra.gmra.mxu1 %vm918_vm2, %v1987_v25 }
 0x43e   :  { %4011 = vmatprep.mubr.msk.bf16.mxu1 %vm4267_vm1, %v4266_v17 }
 0x43f   :  { %4006 = vmatmul.mubr.msk.bf16.vlgmr.msra.gmra.mxu0 %vm918_vm2, %v1990_v31 }
 0x440   :  { %4017 = vmatprep.mubr.msk.bf16.mxu0 %vm4267_vm1, %v4266_v17 }
 0x4a6   :  { %v1282_v32 = vpop.f32.mrf.mxu1 }
 0x4a7   :  { %v1326_v34 = vpop.f32.mrf.mxu0 }
 0x4a8   :  { %v3965_v35 = vpop.f32.mrf.mxu1 }
 0x4a9   :  { %v3971_v37 = vpop.f32.mrf.mxu0 }
 0x4aa   :  { %v1285_v38 = vpop.f32.mrf.mxu1 }
 0x4ab   :  { %v1329_v39 = vpop.f32.mrf.mxu0 }
 0x4ac   :  { %v3966_v42 = vpop.f32.mrf.mxu1 }
 0x4ad   :  { %v3972_v43 = vpop.f32.mrf.mxu0 }
 0x4e2   :  { %v1370_v14 = vpop.f32.mrf.mxu1 }
 0x4e3   :  { %v1421_v12 = vcombine.low %v1282_v32, %v1370_v14  ;;  %v1422_v56 = vcombine.high %v1282_v32, %v1370_v14 }
 0x4e4   :  { %v3977_v45 = vpop.f32.mrf.mxu1  ;;  %v1414_v46 = vpop.f32.mrf.mxu0 }
 0x4e5   :  { %v1437_v48 = vcombine.low %v1326_v34, %v1414_v46  ;;  %v1438_v49 = vcombine.high %v1326_v34, %v1414_v46  ;;  %v1429_v53 = vrot.slane %v1421_v12, %v4368_v47  ;;  %v1436_v55 = vrot.slane %v1422_v56, %v4368_v47 }
 0x4e6   :  { %v1373_v50 = vpop.f32.mrf.mxu1  ;;  %v3983_v13 = vpop.f32.mrf.mxu0 }
 0x4e7   :  { %v1489_v52 = vcombine.low %v1285_v38, %v1373_v50  ;;  %v1490_v63 = vcombine.high %v1285_v38, %v1373_v50  ;;  %v1445_v0 = vrot.slane %v1437_v48, %v4368_v47  ;;  %v1452_v18 = vrot.slane %v1438_v49, %v4368_v47 }
 0x4e8   :  { %v3978_v57 = vpop.f32.mrf.mxu1  ;;  %v1417_v40 = vpop.f32.mrf.mxu0 }
 0x4e9   :  { %v1453_v36 = vcombine.low %v1429_v53, %v1445_v0  ;;  %v1454_v51 = vcombine.high %v1429_v53, %v1445_v0  ;;  %v1469_v58 = vcombine.low %v1436_v55, %v1452_v18  ;;  %v1470_v59 = vcombine.high %v1436_v55, %v1452_v18 }
 0x4ea   :  { %v1505_v26 = vcombine.low %v1329_v39, %v1417_v40  ;;  %v1506_v28 = vcombine.high %v1329_v39, %v1417_v40  ;;  %v3984_v60 = vpop.f32.mrf.mxu0  ;;  %v1497_v8 = vrot.slane %v1489_v52, %v4368_v47  ;;  %v1504_v5 = vrot.slane %v1490_v63, %v4368_v47 }
 0x4eb   :  { %v1461_v41 = vrot.slane %v1453_v36, %v4384_v2  ;;  %v1468_v61 = vrot.slane %v1454_v51, %v4384_v2  ;;  %v1477_v62 = vrot.slane %v1469_v58, %v4384_v2  ;;  %v1484_v1 = vrot.slane %v1470_v59, %v4384_v2 }
 0x4ec   :  { %v1513_v3 = vrot.slane %v1505_v26, %v4368_v47  ;;  %v1520_v4 = vrot.slane %v1506_v28, %v4368_v47 }
 0x4ed   :  { %v1557_v6 = vcombine.low %v1461_v41, %v1468_v61  ;;  %v3795_v9 = vcombine.high %v1461_v41, %v1468_v61  ;;  %v1573_v10 = vcombine.low %v1477_v62, %v1484_v1  ;;  %v3796_v7 = vcombine.high %v1477_v62, %v1484_v1 }
 0x4ee   :  { %v1521_v54 = vcombine.low %v1497_v8, %v1513_v3  ;;  %v1522_v19 = vcombine.high %v1497_v8, %v1513_v3  ;;  %v1537_v27 = vcombine.low %v1504_v5, %v1520_v4  ;;  %v1538_v33 = vcombine.high %v1504_v5, %v1520_v4 }
 0x4ef   :  { %v1564_v20 = vrot.slane %v1557_v6, %v4368_v47  ;;  %v1572_v21 = vrot.slane %v3795_v9, %v4368_v47  ;;  %v1580_v22 = vrot.slane %v1573_v10, %v4368_v47  ;;  %v1588_v23 = vrot.slane %v3796_v7, %v4368_v47 }
 0x4f0   :  { %v1529_v24 = vrot.slane %v1521_v54, %v4384_v2  ;;  %v1536_v25 = vrot.slane %v1522_v19, %v4384_v2  ;;  %v1545_v29 = vrot.slane %v1537_v27, %v4384_v2  ;;  %v1552_v31 = vrot.slane %v1538_v33, %v4384_v2 }
 0x4f1   :  { %v1589_v32 = vcombine.low %v1564_v20, %v1572_v21  ;;  %v1590_v34 = vcombine.high %v1564_v20, %v1572_v21  ;;  %v1605_v38 = vcombine.low %v1580_v22, %v1588_v23  ;;  %v1606_v39 = vcombine.high %v1580_v22, %v1588_v23 }
 0x4f2   :  { %v1625_v35 = vcombine.low %v1529_v24, %v1536_v25  ;;  %v3797_v37 = vcombine.high %v1529_v24, %v1536_v25  ;;  %v1641_v42 = vcombine.low %v1545_v29, %v1552_v31  ;;  %v3798_v43 = vcombine.high %v1545_v29, %v1552_v31 }
 0x4f3   :  { %v4754_v14 = vrot.slane %v1589_v32, %v4384_v2  ;;  %v1604_v12 = vrot.slane %v1590_v34, %v4384_v2  ;;  %v4760_v48 = vrot.slane %v1605_v38, %v4384_v2  ;;  %v1620_v49 = vrot.slane %v1606_v39, %v4384_v2 }
 0x4f4   :  { %v1632_v56 = vrot.slane %v1625_v35, %v4368_v47  ;;  %v1640_v45 = vrot.slane %v3797_v37, %v4368_v47  ;;  %v1648_v53 = vrot.slane %v1641_v42, %v4368_v47  ;;  %v1656_v50 = vrot.slane %v3798_v43, %v4368_v47 }
 0x4f5   :  { %v2571_v46 = vpop.f32.mrf.mxu1  ;;  %v1621_v0 = vcombine.low %v4754_v14, %v4760_v48  ;;  %v1622_v18 = vcombine.high %v4754_v14, %v4760_v48  ;;  %v1624_v57 = vcombine.high %v1604_v12, %v1620_v49  ;;  %v1623_v8 = vcombine.low %v1604_v12, %v1620_v49 }
 0x4f6   :  { %v4765_v13 = vmul.f32 0.35355338, %v2571_v46  ;;  %v1657_v55 = vcombine.low %v1632_v56, %v1640_v45  ;;  %v1673_v51 = vcombine.low %v1648_v53, %v1656_v50  ;;  %v1658_v58 = vcombine.high %v1632_v56, %v1640_v45 }
 0x4f7   :  { %v3989_v52 = vpop.f32.mrf.mxu1  ;;  %v2618_v63 = vpop.f32.mrf.mxu0  ;;  %v1674_v60 = vcombine.high %v1648_v53, %v1656_v50 }
 0x4f8   :  { %v2721_v40 = vmul.f32 0.35355338, %v2618_v63  ;;  %v2727_v36 = vsel %vm1115_vm3, %v4765_v13, -inf  ;;  %v4774_v28 = vrot.slane %v1657_v55, %v4384_v2  ;;  %v4777_v61 = vrot.slane %v1673_v51, %v4384_v2 }
 0x4f9   :  { %v3995_v59 = vpop.f32.mrf.mxu0  ;;  %2728 = vmax.xlane.f32.xlu0 %v2727_v36  ;;  %v2574_v26 = vpop.f32.mrf.mxu1  ;;  %v1672_v62 = vrot.slane %v1658_v58, %v4384_v2  ;;  %v1688_v5 = vrot.slane %v1674_v60, %v4384_v2 }
 0x4fa   :  { %v2720_v41 = vmul.f32 0.35355338, %v2574_v26  ;;  %v2733_v4 = vsel %vm1115_vm3, %v2721_v40, -inf  ;;  %v1690_v10 = vcombine.high %v4774_v28, %v4777_v61  ;;  %v1689_v7 = vcombine.low %v4774_v28, %v4777_v61 }
 0x4fb   :  { %v3990_v1 = vpop.f32.mrf.mxu1  ;;  %v2621_v3 = vpop.f32.mrf.mxu0  ;;  %v1692_v20 = vcombine.high %v1672_v62, %v1688_v5  ;;  %v1691_v21 = vcombine.low %v1672_v62, %v1688_v5 }
 0x4fc   :  { %v2722_v6 = vmul.f32 0.35355338, %v2621_v3  ;;  %v2730_v9 = vsel %vm1115_vm3, %v2720_v41, -inf  ;;  %v4787_v33 = vpack.i.bf16 %v1690_v10, %v1622_v18 }
 0x4fd   :  { %v3996_v54 = vpop.f32.mrf.mxu0  ;;  %2734 = vmax.xlane.f32.xlu0 %v2733_v4  ;;  %2731 = vmax.xlane.f32.xlu1 %v2730_v9  ;;  %v2665_v19 = vpop.f32.mrf.mxu1  ;;  %v4789_v24 = vpack.i.bf16 %v1692_v20, %v1624_v57  ;;  %v4791_v25 = vpack.i.bf16 %v1691_v21, %v1623_v8 }
 0x4fe   :  { %v2723_v27 = vmul.f32 0.35355338, %v2665_v19  ;;  %v2736_v31 = vsel %vm1115_vm3, %v2722_v6, -inf }
 0x4ff   :  { %v4001_v22 = vpop.f32.mrf.mxu1  ;;  %v2712_v23 = vpop.f32.mrf.mxu0 }
 0x500   :  { %v2725_v29 = vmul.f32 0.35355338, %v2712_v23  ;;  %v2739_v32 = vsel %vm1115_vm3, %v2723_v27, -inf }
 0x501   :  { %v4007_v34 = vpop.f32.mrf.mxu0  ;;  %2737 = vmax.xlane.f32.xlu0 %v2736_v31  ;;  %2740 = vmax.xlane.f32.xlu1 %v2739_v32  ;;  %v2668_v35 = vpop.f32.mrf.mxu1  ;;  %v4211_v31 = vld [vmem:[%s5051_s2] sm:$0xff]  }
 0x502   :  { %v4795_v37 = vmul.f32 0.35355338, %v2668_v35  ;;  %v2745_v43 = vsel %vm1115_vm3, %v2725_v29, -inf }
 0x503   :  { %v4002_v38 = vpop.f32.mrf.mxu1  ;;  %v2715_v39 = vpop.f32.mrf.mxu0 }
 0x504   :  { %v2726_v42 = vmul.f32 0.35355338, %v2715_v39  ;;  %v2742_v12 = vsel %vm1115_vm3, %v4795_v37, -inf }
 0x505   :  { %v4008_v56 = vpop.f32.mrf.mxu0  ;;  %2746 = vmax.xlane.f32.xlu1 %v2745_v43  ;;  %2743 = vmax.xlane.f32.xlu0 %v2742_v12 }
 0x506   :  { %v2748_v45 = vsel %vm1115_vm3, %v2726_v42, -inf }
 0x509   :  { %2749 = vmax.xlane.f32.xlu0 %v2748_v45 }
 0x516   :  { %2259 = vrot.lane.b32.xlu1 %v4334_v11, %s4265_s13 }
 0x51a   :  { %2263 = vrot.lane.b32.xlu1 %v4477_v16, %s4265_s13 }
 0x51f   :  { %2261 = vrot.lane.b32.xlu0 %v4481_v44, %s4265_s13 }
 0x582   :  { %v2729_v46 = vpop.xlane.xlu0 %2728 }
 0x583   :  { %v2751_v49 = vsub.f32 %v4765_v13, %v2729_v46 }
 0x585   :  { %v2759_v53 = vmul.f32 1.442695, %v2751_v49 }
 0x586   :  { %v2735_v50 = vpop.xlane.xlu0 %2734  ;;  %v2732_v52 = vpop.xlane.xlu1 %2731 }
 0x587   :  { %4179 = vpow2.f32 %v2759_v53  ;;  %v2753_v63 = vsub.f32 %v2721_v40, %v2735_v50  ;;  %v2752_v18 = vsub.f32 %v2720_v41, %v2732_v52 }
 0x589   :  { %v2763_v55 = vmul.f32 1.442695, %v2753_v63  ;;  %v2761_v57 = vmul.f32 1.442695, %v2752_v18 }
 0x58a   :  { %v2738_v36 = vpop.xlane.xlu0 %2737  ;;  %v2741_v51 = vpop.xlane.xlu1 %2740 }
 0x58b   :  { %4181 = vpow2.f32 %v2763_v55  ;;  %v2754_v11 = vsub.f32 %v2722_v6, %v2738_v36  ;;  %v2755_v58 = vsub.f32 %v2723_v27, %v2741_v51 }
 0x58c   :  { %4183 = vpow2.f32 %v2761_v57 }
 0x58d   :  { %v2765_v16 = vmul.f32 1.442695, %v2754_v11  ;;  %v2767_v59 = vmul.f32 1.442695, %v2755_v58 }
 0x58e   :  { %v2747_v44 = vpop.xlane.xlu1 %2746  ;;  %v2744_v26 = vpop.xlane.xlu0 %2743 }
 0x58f   :  { %4185 = vpow2.f32 %v2765_v16  ;;  %v2757_v13 = vsub.f32 %v2725_v29, %v2747_v44  ;;  %v2756_v23 = vsub.f32 %v4795_v37, %v2744_v26 }
 0x590   :  { %4187 = vpow2.f32 %v2767_v59 }
 0x591   :  { %v2771_v60 = vmul.f32 1.442695, %v2757_v13  ;;  %v2769_v29 = vmul.f32 1.442695, %v2756_v23 }
 0x592   :  { %v2750_v8 = vpop.xlane.xlu0 %2749 }
 0x593   :  { %v2758_v62 = vsub.f32 %v2726_v42, %v2750_v8  ;;  %4189 = vpow2.f32 %v2771_v60 }
 0x594   :  { %v4808_v40 = vpop.eup %4179 }
 0x595   :  { %v2775_v41 = vsel %vm1115_vm3, %v4808_v40, 0.0  ;;  %v2773_v1 = vmul.f32 1.442695, %v2758_v62 }
 0x596   :  { %2776 = vadd.xlane.f32.xlu1 %v2775_v41  ;;  %v2262_v35 = vpop.permute.xlu0 %2261 }
 0x597   :  { %4191 = vpow2.f32 %v2773_v1  ;;  %v2272_v38 = vshrl.u32 %v2262_v35, 16 }
 0x598   :  { %v4812_v3 = vpop.eup %4181  ;;  %4193 = vpow2.f32 %v2769_v29 }
 0x599   :  { %v4814_v4 = vpop.eup %4183  ;;  %v2781_v5 = vsel %vm1115_vm3, %v4812_v3, 0.0 }
 0x59a   :  { %2782 = vadd.xlane.f32.xlu1 %v2781_v5  ;;  %v2778_v6 = vsel %vm1115_vm3, %v4814_v4, 0.0 }
 0x59b   :  { %2779 = vadd.xlane.f32.xlu0 %v2778_v6 }
 0x59c   :  { %v4820_v9 = vpop.eup %4185 }
 0x59d   :  { %v2784_v10 = vsel %vm1115_vm3, %v4820_v9, 0.0  ;;  %v4824_v54 = vpop.eup %4187 }
 0x59e   :  { %v2787_v19 = vsel %vm1115_vm3, %v4824_v54, 0.0 }
 0x59f   :  { %2785 = vadd.xlane.f32.xlu0 %v2784_v10 }
 0x5a0   :  { %v4828_v20 = vpop.eup %4189 }
 0x5a1   :  { %v2793_v21 = vsel %vm1115_vm3, %v4828_v20, 0.0 }
 0x5a3   :  { %2788 = vadd.xlane.f32.xlu0 %v2787_v19 }
 0x5a4   :  { %v4832_v27 = vpop.eup %4191 }
 0x5a5   :  { %v2796_v22 = vsel %vm1115_vm3, %v4832_v27, 0.0  ;;  %v4846_v32 = vpop.eup %4193 }
 0x5a7   :  { %2794 = vadd.xlane.f32.xlu0 %v2793_v21 }
 0x5ab   :  { %2797 = vadd.xlane.f32.xlu0 %v2796_v22  ;;  %2265 = vrot.lane.b32.xlu1 %v4479_v15, %s4265_s13  ;;  %v2790_v15 = vsel %vm1115_vm3, %v4846_v32, 0.0 }
 0x5c1   :  { %4104 = vrot.lane.b32.xlu0 %v4787_v33, %s4271_s14  ;;  %v4212_v33 = vld [vmem:[%s5051_s2 + $0x8] sm:$0xff]  }
 0x5c5   :  { %4114 = vrot.lane.b32.xlu0 %v4789_v24, %s4272_s15  ;;  %v2260_v24 = vpop.permute.xlu1 %2259 }
 0x5c6   :  { %v2271_v39 = vshrl.u32 %v2260_v24, 16  ;;  %v2269_v42 = vpack.i.b16 %v2262_v35, %v2260_v24 }
 0x5c8   :  { %v2273_v56 = vpack.i.b16 %v2272_v38, %v2271_v39  ;;  %v2283_v45 = vcombine.high %v2269_v42, %v4362_v30  ;;  %v2290_v52 = vrot.slane %v2269_v42, %v4368_v47 }
 0x5c9   :  { %3336 = vrot.lane.b32.xlu0 %v4211_v31, %s4273_s18  ;;  %v2264_v34 = vpop.permute.xlu1 %2263 }
 0x5ca   :  { %v2279_v49 = vshrl.u32 %v2264_v34, 16  ;;  %v2349_v63 = vcombine.high %v2273_v56, %v4362_v30  ;;  %v2297_v36 = vrot.slane %v2283_v45, %v4368_v47  ;;  %v2356_v26 = vrot.slane %v2273_v56, %v4368_v47 }
 0x5cc   :  { %v2363_v13 = vrot.slane %v2349_v63, %v4368_v47 }
 0x5cf   :  { %2791 = vadd.xlane.f32.xlu1 %v2790_v15 }
 0x5e0   :  { %3338 = vrot.lane.b32.xlu1 %v4212_v33, %s4273_s18 }
 0x5e4   :  { %4109 = vrot.lane.b32.xlu1 %v4791_v25, %s4274_s21 }
 0x61f   :  { %v2777_v37 = vpop.xlane.xlu1 %2776 }
 0x620   :  { %4195 = vrcp.f32 %v2777_v37 }
 0x623   :  { %v2783_v43 = vpop.xlane.xlu1 %2782 }
 0x624   :  { %v2780_v12 = vpop.xlane.xlu0 %2779 }
 0x625   :  { %4197 = vrcp.f32 %v2780_v12 }
 0x626   :  { %4199 = vrcp.f32 %v2783_v43 }
 0x627   :  { %v2266_v46 = vpop.permute.xlu1 %2265 }
 0x628   :  { %v2277_v53 = vpack.i.b16 %v2266_v46, %v2264_v34  ;;  %v2280_v50 = vshrl.u32 %v2266_v46, 16  ;;  %v2786_v25 = vpop.xlane.xlu0 %2785 }
 0x629   :  { %4201 = vrcp.f32 %v2786_v25 }
 0x62a   :  { %v2281_v18 = vpack.i.b16 %v2280_v50, %v2279_v49  ;;  %v2298_v55 = vcombine.high %v2277_v53, %v4362_v30  ;;  %v2305_v57 = vrot.slane %v2277_v53, %v4368_v47 }
 0x62c   :  { %v2312_v51 = vrot.slane %v2298_v55, %v4368_v47  ;;  %v2313_v11 = vcombine.low %v2290_v52, %v2305_v57  ;;  %v2314_v58 = vcombine.high %v2290_v52, %v2305_v57  ;;  %v2364_v16 = vcombine.high %v2281_v18, %v4362_v30  ;;  %v2789_v59 = vpop.xlane.xlu0 %2788 }
 0x62d   :  { %v4196_v44 = vpop.eup %4195  ;;  %v2371_v60 = vrot.slane %v2281_v18, %v4368_v47  ;;  %4203 = vrcp.f32 %v2789_v59 }
 0x62e   :  { %v2321_v8 = vrot.slane %v2313_v11, %v4384_v2  ;;  %v2328_v62 = vrot.slane %v2314_v58, %v4384_v2  ;;  %v2329_v41 = vcombine.low %v2297_v36, %v2312_v51  ;;  %v2330_v1 = vcombine.high %v2297_v36, %v2312_v51 }
 0x62f   :  { %v2378_v5 = vrot.slane %v2364_v16, %v4368_v47  ;;  %v2379_v6 = vcombine.low %v2356_v26, %v2371_v60  ;;  %v2380_v10 = vcombine.high %v2356_v26, %v2371_v60  ;;  %v4870_v30 = vmul.f32 %v4196_v44, %v4808_v40 }
 0x630   :  { %v2337_v19 = vrot.slane %v2329_v41, %v4384_v2  ;;  %v2344_v21 = vrot.slane %v2330_v1, %v4384_v2  ;;  %v2415_v22 = vcombine.low %v2321_v8, %v2328_v62  ;;  %v3807_v23 = vcombine.high %v2321_v8, %v2328_v62  ;;  %v2795_v29 = vpop.xlane.xlu0 %2794 }
 0x631   :  { %v2387_v31 = vrot.slane %v2379_v6, %v4384_v2  ;;  %v2394_v15 = vrot.slane %v2380_v10, %v4384_v2  ;;  %v2395_v33 = vcombine.low %v2363_v13, %v2378_v5  ;;  %v2396_v24 = vcombine.high %v2363_v13, %v2378_v5 }
 0x632   :  { %v2422_v34 = vrot.slane %v2415_v22, %v4368_v47  ;;  %v2430_v35 = vrot.slane %v3807_v23, %v4368_v47  ;;  %v2431_v37 = vcombine.low %v2337_v19, %v2344_v21  ;;  %v3808_v40 = vcombine.high %v2337_v19, %v2344_v21  ;;  %v4198_v38 = vpop.eup %4197 }
 0x633   :  { %v2403_v39 = vrot.slane %v2395_v33, %v4384_v2  ;;  %v2410_v42 = vrot.slane %v2396_v24, %v4384_v2  ;;  %v2465_v43 = vcombine.low %v2387_v31, %v2394_v15  ;;  %v3809_v12 = vcombine.high %v2387_v31, %v2394_v15  ;;  %v4200_v53 = vpop.eup %4199 }
 0x634   :  { %v2438_v56 = vrot.slane %v2431_v37, %v4368_v47  ;;  %v2446_v45 = vrot.slane %v3808_v40, %v4368_v47  ;;  %4205 = vrcp.f32 %v2795_v29  ;;  %v2798_v46 = vpop.xlane.xlu0 %2797  ;;  %v2447_v49 = vcombine.low %v2422_v34, %v2430_v35 }
 0x635   :  { %v2472_v50 = vrot.slane %v2465_v43, %v4368_v47  ;;  %v2480_v25 = vrot.slane %v3809_v12, %v4368_v47  ;;  %v2481_v52 = vcombine.low %v2403_v39, %v2410_v42  ;;  %v3810_v63 = vcombine.high %v2403_v39, %v2410_v42 }
 0x636   :  { %4207 = vrcp.f32 %v2798_v46  ;;  %v2455_v18 = vcombine.low %v2438_v56, %v2446_v45  ;;  %v2808_v55 = vmul.f32 %v4198_v38, %v4814_v4  ;;  %v4202_v57 = vpop.eup %4201  ;;  %v3859_v58 = vpack.c.bf16 %v4870_v30, %v4870_v30 }
 0x637   :  { %v2488_v36 = vrot.slane %v2481_v52, %v4368_v47  ;;  %v2496_v51 = vrot.slane %v3810_v63, %v4368_v47  ;;  %v2497_v11 = vcombine.low %v2472_v50, %v2480_v25  ;;  %v2809_v44 = vmul.f32 %v4200_v53, %v4812_v3 }
 0x638   :  { %v2462_v16 = vrot.slane %v2455_v18, %v4384_v2  ;;  %v3860_v59 = vpack.c.bf16 %v2808_v55, %v2808_v55  ;;  %v2454_v26 = vrot.slane %v2447_v49, %v4384_v2  ;;  %2848 = vst.msk [vmem:[#allocation4 + $0x20] sm:$0xf] %vm1236_vm4, %v3859_v58  ;;  %v2810_v60 = vmul.f32 %v4202_v57, %v4820_v9  ;;  %v4105_v42 = vpop.permute.xlu0 %4104 }
 0x639   :  { %v2505_v13 = vcombine.low %v2488_v36, %v2496_v51  ;;  %v3861_v8 = vpack.c.bf16 %v2809_v44, %v2809_v44  ;;  %v2504_v41 = vrot.slane %v2497_v11, %v4384_v2  ;;  %v2815_v15 = vpack.c.bf16 %v2808_v55, %v4870_v30 }
 0x63a   :  { %v4204_v4 = vpop.eup %4203  ;;  %2849 = vst.msk [vmem:[#allocation4 + $0x24] sm:$0xf] %vm1236_vm4, %v3860_v59  ;;  %v2463_v62 = vcombine.low %v2454_v26, %v2462_v16  ;;  %v3862_v3 = vpack.c.bf16 %v2810_v60, %v2810_v60  ;;  %v2464_v23 = vcombine.high %v2454_v26, %v2462_v16  ;;  %v2816_v37 = vpack.c.bf16 %v2810_v60, %v2809_v44 }
 0x63b   :  { %v2512_v1 = vrot.slane %v2505_v13, %v4384_v2  ;;  %v4898_v5 = vmul.f32 %v4204_v4, %v4824_v54  ;;  %2850 = vst.msk [vmem:[#allocation4 + $0x28] sm:$0xf] %vm1236_vm4, %v3861_v8  ;;  %v4107_v12 = vunpack.i.h.bf16 %v4105_v42  ;;  %v4106_v56 = vunpack.i.l.bf16 %v4105_v42 }
 0x63c   :  { %2851 = vst.msk [vmem:[#allocation4 + $0x2c] sm:$0xf] %vm1236_vm4, %v3862_v3  ;;  %v2519_v21 = vshrl.u32 %v2463_v62, 16  ;;  %v2527_v35 = vshrl.u32 %v2464_v23, 16  ;;  %v4115_v45 = vpop.permute.xlu0 %4114 }
 0x63d   :  { %v2513_v6 = vcombine.low %v2504_v41, %v2512_v1  ;;  %v2514_v10 = vcombine.high %v2504_v41, %v2512_v1  ;;  %v3863_v19 = vpack.c.bf16 %v4898_v5, %v4898_v5  ;;  %v1717_v50 = vsel %vm918_vm2, %v1621_v0, %v4106_v56 }
 0x63e   :  { %v4117_v25 = vunpack.i.h.bf16 %v4115_v45  ;;  %v4116_v52 = vunpack.i.l.bf16 %v4115_v45 }
 0x63f   :  { %v2517_v9 = vpack.i.b16 %v2513_v6, %v2463_v62  ;;  %v2520_v22 = vshrl.u32 %v2513_v6, 16  ;;  %2852 = vst.msk [vmem:[#allocation4 + $0x30] sm:$0xf] %vm1236_vm4, %v3863_v19  ;;  %v2528_v31 = vshrl.u32 %v2514_v10, 16  ;;  %v2525_v34 = vpack.i.b16 %v2514_v10, %v2464_v23 }
 0x641   :  { %v4206_v29 = vpop.eup %4205  ;;  %4010 = vmatpush3.bf16.msra.mxu1 %v2517_v9  ;;  %v2521_v54 = vpack.i.b16 %v2520_v22, %v2519_v21  ;;  %v2529_v39 = vpack.i.b16 %v2528_v31, %v2527_v35 }
 0x642   :  { %4021 = vmatprep.subr.bf16.mxu1 %v4266_v17  ;;  %v2813_v33 = vmul.f32 %v4206_v29, %v4828_v20 }
 0x643   :  { %v4208_v24 = vpop.eup %4207  ;;  %4016 = vmatpush3.bf16.msra.mxu0 %v2521_v54 }
 0x644   :  { %4012 = vmatmul.mubr.msk.bf16.vlgmr.msra.gmra.mxu1 %vm1115_vm3, %v2815_v15  ;;  %4027 = vmatprep.subr.bf16.mxu0 %v4266_v17  ;;  %v2814_v40 = vmul.f32 %v4208_v24, %v4832_v27  ;;  %v3865_v38 = vpack.c.bf16 %v2813_v33, %v2813_v33 }
 0x645   :  { %4022 = vmatpush3.bf16.msra.mxu1 %v2525_v34  ;;  %4023 = vmatprep.mubr.msk.bf16.mxu1 %vm4267_vm1, %v4266_v17 }
 0x646   :  { %4018 = vmatmul.mubr.msk.bf16.vlgmr.msra.gmra.mxu0 %vm1115_vm3, %v2816_v37  ;;  %v3866_v20 = vpack.c.bf16 %v2814_v40, %v2814_v40  ;;  %2854 = vst.msk [vmem:[#allocation4 + $0x38] sm:$0xf] %vm1236_vm4, %v3865_v38  ;;  %v2818_v30 = vpack.c.bf16 %v2814_v40, %v2813_v33 }
 0x647   :  { %4028 = vmatpush3.bf16.msra.mxu0 %v2529_v39  ;;  %4029 = vmatprep.mubr.msk.bf16.mxu0 %vm4267_vm1, %v4266_v17  ;;  %v1718_v17 = vsel %vm918_vm2, %v1689_v7, %v4107_v12 }
 0x648   :  { %2855 = vst.msk [vmem:[#allocation4 + $0x3c] sm:$0xf] %vm1236_vm4, %v3866_v20 }
 0x64e   :  { %4030 = vmatmul.mubr.msk.bf16.vlgmr.msra.gmra.mxu0 %vm1115_vm3, %v2818_v30 }
 0x658   :  { %v2792_v27 = vpop.xlane.xlu1 %2791 }
 0x659   :  { %4209 = vrcp.f32 %v2792_v27 }
 0x65c   :  { %v3339_v43 = vpop.permute.xlu1 %3338 }
 0x65d   :  { %4033 = vmatprep.subr.bf16.mxu1 %v3339_v43 }
 0x660   :  { %v4110_v46 = vpop.permute.xlu1 %4109 }
 0x661   :  { %v4112_v49 = vunpack.i.h.bf16 %v4110_v46  ;;  %v4111_v53 = vunpack.i.l.bf16 %v4110_v46 }
 0x663   :  { %v1719_v63 = vsel %vm1115_vm3, %v1717_v50, %v4111_v53  ;;  %v1720_v18 = vsel %vm1115_vm3, %v1718_v17, %v4112_v49 }
 0x664   :  { %v1722_v55 = vsel %vm1721_vm5, %v1719_v63, %v4116_v52  ;;  %v1723_v57 = vsel %vm1721_vm5, %v1720_v18, %v4117_v25 }
 0x665   :  { %v3334_v36 = vpack.c.bf16 %v1723_v57, %v1722_v55 }
 0x666   :  { %v4210_v51 = vpop.eup %4209 }
 0x667   :  { %v2812_v28 = vmul.f32 %v4210_v51, %v4846_v32 }
 0x669   :  { %v2817_v61 = vpack.c.bf16 %v2812_v28, %v4898_v5  ;;  %v3864_v7 = vpack.c.bf16 %v2812_v28, %v2812_v28 }
 0x66b   :  { %2853 = vst.msk [vmem:[#allocation4 + $0x34] sm:$0xf] %vm1236_vm4, %v3864_v7  ;;  %4024 = vmatmul.mubr.msk.bf16.vlgmr.msra.gmra.mxu1 %vm1115_vm3, %v2817_v61 }
 0x66c   :  { %4037 = vmatprep.mubr.msk.bf16.mxu1 %vm47_vm0, %v3334_v36  ;;  %4034 = vmatpush3.bf16.msra.mxu1 %v3339_v43 }
 0x704   :  { %v2893_v14 = vpop.f32.mrf.mxu1 }
 0x706   :  { %v4013_v48 = vpop.f32.mrf.mxu1  ;;  %v2937_v0 = vpop.f32.mrf.mxu0 }
 0x708   :  { %v2896_v11 = vpop.f32.mrf.mxu1  ;;  %v4019_v58 = vpop.f32.mrf.mxu0 }
 0x70a   :  { %v4014_v16 = vpop.f32.mrf.mxu1  ;;  %v2940_v59 = vpop.f32.mrf.mxu0 }
 0x70c   :  { %v4020_v44 = vpop.f32.mrf.mxu0 }
 0x70e   :  { %v3025_v26 = vpop.f32.mrf.mxu0 }
 0x70f   :  { %v3048_v60 = vcombine.low %v2937_v0, %v3025_v26  ;;  %v3049_v8 = vcombine.high %v2937_v0, %v3025_v26 }
 0x710   :  { %v4031_v32 = vpop.f32.mrf.mxu0 }
 0x711   :  { %v3056_v3 = vrot.slane %v3048_v60, %v4368_v47  ;;  %v3063_v6 = vrot.slane %v3049_v8, %v4368_v47  ;;  %v3337_v8 = vpop.permute.xlu0 %3336 }
 0x712   :  { %v3028_v13 = vpop.f32.mrf.mxu0  ;;  %4035 = vmatprep.subr.bf16.mxu1 %v3337_v8 }
 0x713   :  { %v3116_v9 = vcombine.low %v2940_v59, %v3028_v13  ;;  %v3117_v21 = vcombine.high %v2940_v59, %v3028_v13  ;;  %4036 = vmatpush3.bf16.msra.mxu1 %v3337_v8 }
 0x714   :  { %v4032_v4 = vpop.f32.mrf.mxu0 }
 0x715   :  { %v3124_v38 = vrot.slane %v3116_v9, %v4368_v47  ;;  %v3131_v39 = vrot.slane %v3117_v21, %v4368_v47 }
 0x72b   :  { %v2981_v62 = vpop.f32.mrf.mxu1 }
 0x72c   :  { %v3032_v41 = vcombine.low %v2893_v14, %v2981_v62  ;;  %v3033_v1 = vcombine.high %v2893_v14, %v2981_v62 }
 0x72d   :  { %v4025_v5 = vpop.f32.mrf.mxu1 }
 0x72e   :  { %v3040_v10 = vrot.slane %v3032_v41, %v4368_v47  ;;  %v3047_v19 = vrot.slane %v3033_v1, %v4368_v47 }
 0x72f   :  { %v2984_v22 = vpop.f32.mrf.mxu1 }
 0x730   :  { %v3064_v23 = vcombine.low %v3040_v10, %v3056_v3  ;;  %v3065_v29 = vcombine.high %v3040_v10, %v3056_v3  ;;  %v3080_v54 = vcombine.low %v3047_v19, %v3063_v6  ;;  %v3081_v31 = vcombine.high %v3047_v19, %v3063_v6 }
 0x731   :  { %v3100_v15 = vcombine.low %v2896_v11, %v2984_v22  ;;  %v3101_v33 = vcombine.high %v2896_v11, %v2984_v22  ;;  %v4026_v24 = vpop.f32.mrf.mxu1 }
 0x732   :  { %v3072_v34 = vrot.slane %v3064_v23, %v4384_v2  ;;  %v3079_v35 = vrot.slane %v3065_v29, %v4384_v2  ;;  %v3088_v37 = vrot.slane %v3080_v54, %v4384_v2  ;;  %v3095_v40 = vrot.slane %v3081_v31, %v4384_v2 }
 0x733   :  { %v3108_v20 = vrot.slane %v3100_v15, %v4368_v47  ;;  %v3115_v30 = vrot.slane %v3101_v33, %v4368_v47 }
 0x734   :  { %v3168_v27 = vcombine.low %v3072_v34, %v3079_v35  ;;  %v3827_v42 = vcombine.high %v3072_v34, %v3079_v35  ;;  %v3184_v43 = vcombine.low %v3088_v37, %v3095_v40  ;;  %v3828_v12 = vcombine.high %v3088_v37, %v3095_v40 }
 0x735   :  { %v3132_v56 = vcombine.low %v3108_v20, %v3124_v38  ;;  %v3133_v45 = vcombine.high %v3108_v20, %v3124_v38  ;;  %v3148_v46 = vcombine.low %v3115_v30, %v3131_v39  ;;  %v3149_v49 = vcombine.high %v3115_v30, %v3131_v39 }
 0x736   :  { %v3175_v53 = vrot.slane %v3168_v27, %v4368_v47  ;;  %v3183_v17 = vrot.slane %v3827_v42, %v4368_v47  ;;  %v3191_v50 = vrot.slane %v3184_v43, %v4368_v47  ;;  %v3199_v25 = vrot.slane %v3828_v12, %v4368_v47 }
 0x737   :  { %v3140_v52 = vrot.slane %v3132_v56, %v4384_v2  ;;  %v3147_v63 = vrot.slane %v3133_v45, %v4384_v2  ;;  %v3156_v18 = vrot.slane %v3148_v46, %v4384_v2  ;;  %v3163_v55 = vrot.slane %v3149_v49, %v4384_v2  ;;  %v4135_v56 = vld [vmem:[%s5050_s1] sm:$0xff]  }
 0x738   :  { %v3200_v57 = vcombine.low %v3175_v53, %v3183_v17  ;;  %v3216_v36 = vcombine.low %v3191_v50, %v3199_v25  ;;  %v3201_v44 = vcombine.high %v3175_v53, %v3183_v17  ;;  %v3217_v26 = vcombine.high %v3191_v50, %v3199_v25  ;;  %4045 = vmatprep.mubr.msk.bf16.mxu0 %vm47_vm0, %v4135_v56  ;;  %v4213_v53 = vld [vmem:[%s5049_s0 + $0x10] sm:$0xff]  ;;  %v4214_v50 = vld [vmem:[%s5049_s0 + $0x18] sm:$0xff] }
 0x739   :  { %v3236_v51 = vcombine.low %v3140_v52, %v3147_v63  ;;  %v3829_v28 = vcombine.high %v3140_v52, %v3147_v63  ;;  %v3252_v61 = vcombine.low %v3156_v18, %v3163_v55  ;;  %v3830_v7 = vcombine.high %v3156_v18, %v3163_v55  ;;  %v4215_v63 = vld [vmem:[%s5049_s0] sm:$0xff] }
 0x73a   :  { %v3208_v14 = vrot.slane %v3200_v57, %v4384_v2  ;;  %v3224_v48 = vrot.slane %v3216_v36, %v4384_v2  ;;  %v3215_v3 = vrot.slane %v3201_v44, %v4384_v2  ;;  %v3231_v19 = vrot.slane %v3217_v26, %v4384_v2  ;;  %v4216_v57 = vld [vmem:[%s5049_s0 + $0x8] sm:$0xff] }
 0x73b   :  { %v3243_v0 = vrot.slane %v3236_v51, %v4368_v47  ;;  %v3251_v11 = vrot.slane %v3829_v28, %v4368_v47  ;;  %v3259_v58 = vrot.slane %v3252_v61, %v4368_v47  ;;  %v3267_v16 = vrot.slane %v3830_v7, %v4368_v47  ;;  %v4997_v28 = vld [vmem:[%s5050_s1 + $0x8] sm:$0xff]   ;;  %v4138_v7 = vld [vmem:[%s5052_s3] sm:$0xff]  }
 0x73c   :  { %v3232_v59 = vcombine.low %v3208_v14, %v3224_v48  ;;  %v3233_v47 = vcombine.high %v3208_v14, %v3224_v48  ;;  %v3234_v22 = vcombine.low %v3215_v3, %v3231_v19  ;;  %v3235_v54 = vcombine.high %v3215_v3, %v3231_v19  ;;  %v4137_v61 = vld [vmem:[%s5052_s3 + $0x8] sm:$0xff]   ;;  %v4139_v14 = vld [vmem:[%s5053_s4 + $0x38] sm:$0xff]   ;;  %v4140_v48 = vld [vmem:[%s5053_s4 + $0x30] sm:$0xff]  }
 0x73d   :  { %v3268_v32 = vcombine.low %v3243_v0, %v3251_v11  ;;  %v3284_v13 = vcombine.low %v3259_v58, %v3267_v16  ;;  %v3269_v4 = vcombine.high %v3243_v0, %v3251_v11  ;;  %v3285_v60 = vcombine.high %v3259_v58, %v3267_v16  ;;  %4049 = vmatprep.subr.bf16.mxu1 %v4137_v61  ;;  %v4141_v0 = vld [vmem:[%s5053_s4 + $0x28] sm:$0xff]   ;;  %v4142_v11 = vld [vmem:[%s5053_s4 + $0x20] sm:$0xff]   ;;  %v4143_v58 = vld [vmem:[%s5053_s4 + $0x18] sm:$0xff]  }
 0x73f   :  { %v3276_v62 = vrot.slane %v3268_v32, %v4384_v2  ;;  %v3292_v41 = vrot.slane %v3284_v13, %v4384_v2  ;;  %v3283_v1 = vrot.slane %v3269_v4, %v4384_v2  ;;  %v3299_v5 = vrot.slane %v3285_v60, %v4384_v2 }
 0x741   :  { %v3301_v6 = vcombine.high %v3276_v62, %v3292_v41  ;;  %v3300_v10 = vcombine.low %v3276_v62, %v3292_v41  ;;  %v3302_v21 = vcombine.low %v3283_v1, %v3299_v5  ;;  %v3303_v29 = vcombine.high %v3283_v1, %v3299_v5  ;;  %v4144_v41 = vld [vmem:[%s5053_s4 + $0x10] sm:$0xff]   ;;  %v4145_v1 = vld [vmem:[%s5053_s4 + $0x8] sm:$0xff]   ;;  %v4146_v5 = vld [vmem:[%s5053_s4] sm:$0xff]   ;;  %s4275_s4 = smov [#allocation4]  }
 0x742   :  { %s3748_s27 = sshll.u32 %s4275_s4, 4  ;;  %s3749_s27 = int_to_ptr.vmem [resolvable:$true] %s3748_s27 }
 0x743   :  { %v4118_v9 = vpack.i.bf16 %v3301_v6, %v3233_v47  ;;  %v4123_v23 = vpack.i.bf16 %v3302_v21, %v3234_v22  ;;  %v4128_v31 = vpack.i.bf16 %v3303_v29, %v3235_v54  ;;  %s4217_s28 = scalar_lea.vmem %s3749_s27, 1024  ;;  %p4222_p1 = scmp.lt.s32.totalorder %s3749_s27, %s3749_s27 }
 0x744   :  { %p4218_p0 = scmp.ne.s32.totalorder %s3749_s27, %s4217_s28  ;;  %p4223_p2 = scmp.lt.s32.totalorder %s4217_s28, %s4217_s28 }
 0x745   :  { %4119 = vrot.lane.b32.xlu1 %v4118_v9, %s4271_s14 }
 0x746   :  { %p4224_p3 = por %p4223_p2, %p4222_p1 }
 0x748   :  { %p4225_p4 = pnand %p4224_p3, %p4218_p0 }
 0x749   :  { %4124 = vrot.lane.b32.xlu1 %v4123_v23, %s4274_s21 }
 0x74d   :  { %4129 = vrot.lane.b32.xlu1 %v4128_v31, %s4272_s15 }
 0x7b7   :  { %v4120_v15 = vpop.permute.xlu1 %4119 }
 0x7b8   :  { %v4122_v24 = vunpack.i.h.bf16 %v4120_v15  ;;  %v4121_v34 = vunpack.i.l.bf16 %v4120_v15 }
 0x7ba   :  { %v3328_v40 = vsel %vm918_vm2, %v3232_v59, %v4121_v34  ;;  %v3329_v38 = vsel %vm918_vm2, %v3300_v10, %v4122_v24 }
 0x7bb   :  { %v4125_v33 = vpop.permute.xlu1 %4124 }
 0x7bc   :  { %v4127_v35 = vunpack.i.h.bf16 %v4125_v33  ;;  %v4126_v37 = vunpack.i.l.bf16 %v4125_v33 }
 0x7be   :  { %v3330_v30 = vsel %vm1115_vm3, %v3328_v40, %v4126_v37  ;;  %v3331_v27 = vsel %vm1115_vm3, %v3329_v38, %v4127_v35 }
 0x7bf   :  { %v4130_v2 = vpop.permute.xlu1 %4129 }
 0x7c0   :  { %v4132_v39 = vunpack.i.h.bf16 %v4130_v2  ;;  %v4131_v20 = vunpack.i.l.bf16 %v4130_v2 }
 0x7c2   :  { %v3332_v42 = vsel %vm1721_vm5, %v3330_v30, %v4131_v20  ;;  %v3333_v43 = vsel %vm1721_vm5, %v3331_v27, %v4132_v39 }
 0x7c3   :  { %v3335_v12 = vpack.c.bf16 %v3333_v43, %v3332_v42 }
 0x7c5   :  { %4038 = vmatmul.mubr.msk.bf16.vlgmr.msra.gmra.mxu1 %vm47_vm0, %v3335_v12 }
 0x7c6   :  { %4050 = vmatpush3.bf16.msra.mxu1 %v4137_v61 }
 0x7c7   :  { %4051 = vmatprep.subr.bf16.mxu1 %v4138_v7 }
 0x7ca   :  { %4052 = vmatpush3.bf16.msra.mxu1 %v4138_v7 }
 0x885   :  { %v4039_v45 = vpop.f32.mrf.mxu1 }
 0x886   :  { %v3399_v17 = vadd.f32 %v4213_v53, %v4039_v45 }
 0x887   :  { %v3382_v46 = vpop.f32.mrf.mxu1 }
 0x888   :  { %v3397_v18 = vadd.f32 %v4215_v63, %v3382_v46 }
 0x889   :  { %v4040_v49 = vpop.f32.mrf.mxu1 }
 0x88a   :  { %v3400_v25 = vadd.f32 %v4214_v50, %v4040_v49 }
 0x88b   :  { %v3385_v52 = vpop.f32.mrf.mxu1 }
 0x88c   :  { %v3406_v55 = vpack.c.bf16 %v3400_v25, %v3399_v17  ;;  %v3398_v36 = vadd.f32 %v4216_v57, %v3385_v52 }
 0x88e   :  { %v3405_v51 = vpack.c.bf16 %v3398_v36, %v3397_v18  ;;  %4041 = vmatprep.subr.bf16.mxu0 %v3406_v55 }
 0x88f   :  { %4042 = vmatpush3.bf16.msra.mxu0 %v3406_v55 }
 0x890   :  { %4043 = vmatprep.subr.bf16.mxu0 %v3405_v51 }
 0x893   :  { %4044 = vmatpush3.bf16.msra.mxu0 %v3405_v51 }
 0x894   :  { %4057 = vmatprep.subr.bf16.mxu0 %v4139_v14 }
 0x896   :  { %4046 = vmatmul.mubr.msk.bf16.vlgmr.msra.gmra.mxu0 %vm47_vm0, %v4997_v28 }
 0x897   :  { %4058 = vmatpush3.bf16.msra.mxu0 %v4139_v14 }
 0x898   :  { %4059 = vmatprep.subr.bf16.mxu0 %v4140_v48 }
 0x89b   :  { %4060 = vmatpush3.bf16.msra.mxu0 %v4140_v48 }
 0x89c   :  { %4061 = vmatprep.subr.bf16.mxu0 %v4141_v0 }
 0x89f   :  { %4062 = vmatpush3.bf16.msra.mxu0 %v4141_v0 }
 0x8a0   :  { %4063 = vmatprep.subr.bf16.mxu0 %v4142_v11 }
 0x8a3   :  { %4064 = vmatpush3.bf16.msra.mxu0 %v4142_v11 }
 0x8a4   :  { %4065 = vmatprep.subr.bf16.mxu0 %v4143_v58 }
 0x8a7   :  { %4066 = vmatpush3.bf16.msra.mxu0 %v4143_v58 }
 0x8a8   :  { %4067 = vmatprep.subr.bf16.mxu0 %v4144_v41 }
 0x8ab   :  { %4068 = vmatpush3.bf16.msra.mxu0 %v4144_v41 }
 0x8ac   :  { %4069 = vmatprep.subr.bf16.mxu0 %v4145_v1 }
 0x8af   :  { %4070 = vmatpush3.bf16.msra.mxu0 %v4145_v1 }
 0x8b0   :  { %4071 = vmatprep.subr.bf16.mxu0 %v4146_v5 }
 0x8b3   :  { %4072 = vmatpush3.bf16.msra.mxu0 %v4146_v5 }
 0x956   :  { %v4047_v16 = vpop.f32.mrf.mxu0 }
 0x957   :  { %v3474_v60 = vsub.f32 %v3399_v17, %v4047_v16 }
 0x958   :  { %v3457_v59 = vpop.f32.mrf.mxu0 }
 0x959   :  { %v3472_v13 = vsub.f32 %v3397_v18, %v3457_v59 }
 0x95a   :  { %v4048_v44 = vpop.f32.mrf.mxu0 }
 0x95b   :  { %v3475_v26 = vsub.f32 %v3400_v25, %v4048_v44 }
 0x95c   :  { %v3460_v32 = vpop.f32.mrf.mxu0 }
 0x95d   :  { %v3473_v4 = vsub.f32 %v3398_v36, %v3460_v32  ;;  %v3477_v62 = vpack.c.bf16 %v3475_v26, %v3474_v60 }
 0x95f   :  { %v3476_v8 = vpack.c.bf16 %v3473_v4, %v3472_v13 }
 0x961   :  { %4053 = vmatprep.mubr.msk.bf16.mxu1 %vm47_vm0, %v3476_v8 }
 0x962   :  { %4054 = vmatmul.mubr.msk.bf16.vlgmr.msra.gmra.mxu1 %vm47_vm0, %v3477_v62 }
 0x963   :  { %4081 = vmatprep.mubr.msk.bf16.mxu1 %vm47_vm0, %v4135_v56 }
 0xa22   :  { %v4055_v3 = vpop.f32.mrf.mxu1 }
 0xa23   :  { %v3551_v22 = vmax.f32 %v4055_v3, 0.0 }
 0xa24   :  { %v3534_v47 = vpop.f32.mrf.mxu1 }
 0xa25   :  { %v3549_v9 = vmax.f32 %v3534_v47, 0.0 }
 0xa26   :  { %v4056_v6 = vpop.f32.mrf.mxu1 }
 0xa27   :  { %v3552_v10 = vmax.f32 %v4056_v6, 0.0 }
 0xa28   :  { %v3537_v19 = vpop.f32.mrf.mxu1 }
 0xa29   :  { %v3550_v21 = vmax.f32 %v3537_v19, 0.0  ;;  %v3554_v29 = vpack.c.bf16 %v3552_v10, %v3551_v22 }
 0xa2b   :  { %v3553_v23 = vpack.c.bf16 %v3550_v21, %v3549_v9 }
 0xa2d   :  { %4073 = vmatprep.mubr.bf16.mxu0 %v3553_v23 }
 0xa2e   :  { %4074 = vmatmul.mubr.bf16.vlgmr.msra.gmra.mxu0 %v3554_v29 }
 0xaee   :  { %v4075_v54 = vpop.f32.mrf.mxu0 }
 0xaef   :  { %v3670_v33 = vadd.f32 %v4075_v54, %v3474_v60 }
 0xaf0   :  { %v3653_v31 = vpop.f32.mrf.mxu0 }
 0xaf1   :  { %v3668_v35 = vadd.f32 %v3653_v31, %v3472_v13 }
 0xaf2   :  { %v4076_v15 = vpop.f32.mrf.mxu0 }
 0xaf3   :  { %v3671_v24 = vadd.f32 %v4076_v15, %v3475_v26 }
 0xaf4   :  { %v3656_v34 = vpop.f32.mrf.mxu0 }
 0xaf5   :  { %v3673_v37 = vpack.c.bf16 %v3671_v24, %v3670_v33  ;;  %v3669_v2 = vadd.f32 %v3656_v34, %v3473_v4 }
 0xaf7   :  { %v3672_v40 = vpack.c.bf16 %v3669_v2, %v3668_v35  ;;  %4077 = vmatprep.subr.bf16.mxu1 %v3673_v37 }
 0xaf8   :  { %4078 = vmatpush3.bf16.msra.mxu1 %v3673_v37 }
 0xaf9   :  { %4079 = vmatprep.subr.bf16.mxu1 %v3672_v40 }
 0xafc   :  { %4080 = vmatpush3.bf16.msra.mxu1 %v3672_v40 }
 0xaff   :  { %4082 = vmatmul.mubr.msk.bf16.vlgmr.msra.gmra.mxu1 %vm47_vm0, %v4997_v28 }
 0xb00   :  { %4228 = shalt.err (!%p4225_p4)
}
 0xb01   :  { %s4276_s29 = smov 4   ;;  %s4277_s8 = smov [#allocation2]  }
 0xb02   :  { %3754 = dma.vmem_to_hbm [thread:$0]  %s3749_s27, 1024, %s5055_s6, [#allocation5], %s4265_s13, %s4265_s13, %s4276_s29  }
 0xb03   :  { %s3736_s9 = sshll.u32 %s4277_s8, 4  ;;  %s3737_s9 = int_to_ptr.vmem [resolvable:$true] %s3736_s9 }
 0xb04   :  { %s4237_s6 = scalar_lea.vmem %s3737_s9, 512  ;;  %p4242_p6 = scmp.lt.s32.totalorder %s3737_s9, %s3737_s9 }
 0xb05   :  { %p4238_p5 = scmp.ne.s32.totalorder %s3737_s9, %s4237_s6  ;;  %p4243_p7 = scmp.lt.s32.totalorder %s4237_s6, %s4237_s6 }
 0xb07   :  { %p4244_p8 = por %p4243_p7, %p4242_p6 }
 0xb09   :  { %p4245_p9 = pnand %p4244_p8, %p4238_p5 }
 0xbbf   :  { %v4083_v38 = vpop.f32.mrf.mxu1 }
 0xbc0   :  { %v3725_v39 = vsub.f32 %v3670_v33, %v4083_v38 }
 0xbc1   :  { %v3708_v20 = vpop.f32.mrf.mxu1 }
 0xbc2   :  { %3729 = vst.msk [vmem:[#allocation2 + $0x10] sm:$0xff] %vm47_vm0, %v3725_v39  ;;  %v3723_v30 = vsub.f32 %v3668_v35, %v3708_v20 }
 0xbc3   :  { %v4084_v27 = vpop.f32.mrf.mxu1 }
 0xbc4   :  { %3727 = vst.msk [vmem:[#allocation2] sm:$0xff] %vm47_vm0, %v3723_v30  ;;  %v3726_v42 = vsub.f32 %v3671_v24, %v4084_v27 }
 0xbc5   :  { %v3711_v43 = vpop.f32.mrf.mxu1 }
 0xbc6   :  { %3730 = vst.msk [vmem:[#allocation2 + $0x18] sm:$0xff] %vm47_vm0, %v3726_v42  ;;  %v3724_v12 = vsub.f32 %v3669_v2, %v3711_v43 }
 0xbc8   :  { %3728 = vst.msk [vmem:[#allocation2 + $0x8] sm:$0xff] %vm47_vm0, %v3724_v12 }
 0xbc9   :  { %4248 = shalt.err (!%p4245_p9)
}
 0xbca   :  { %s4278_s13 = smov 128  }
 0xbcb   :  { %3742 = dma.vmem_to_hbm [thread:$0]  %s3737_s9, 512, %s5054_s5, [#allocation3], %s4278_s13, %s4278_s13, %s4271_s14  }
 0xbcc   :  { %4257 = dma.done.wait [#allocation3], 512  }
 0xbcd   :  { %4258 = vsyncadd [#allocation3], 4294966784 }
 0xbce   :  { %4259 = dma.done.wait [#allocation5], 1024  }
 0xbcf   :  { %4260 = vsyncadd [#allocation5], 4294966272 }
 0xbd0   :  { %3761 = vsyncpa [#allocation3], 1 }
 0xbd1   :  { %3762 = vsyncpa [#allocation5], 1 }

</bundles_post_ra>
